<compile_context>
chip_gen: v7x
topology: tpu7x:2x2x1
jax: 0.10.0
libtpu: 0.0.40
codegen_flags: <defaults>
</compile_context>

<pallas_src>
import jax
import jax.numpy as jnp
from jax.experimental import pallas as pl
from jax.experimental.pallas import tpu as pltpu

# ----------------------------- model dims (small, synthetic) -----------------------------
B = 2          # batch
N_PART = 8     # number of parts (sequence length)
D_RAW = 16     # raw part feature dim (tokenizer input)
D_MODEL = 32
N_HEAD = 4
D_FF = 4 * D_MODEL
N_LAYER = 2
D_PART = 10    # untokenizer output dim (part_info)
D_OUT_PAD = 128  # lane-dense padded untokenizer width
N_GTOK = 6     # size of the g-token embedding table
LN_EPS = 1e-5
NEG_INF = -1e30


# ----------------------------- fused Pallas kernel -----------------------------
def _layer_norm(x, g, b):
    mu = jnp.mean(x, axis=-1, keepdims=True)
    xc = x - mu
    var = jnp.mean(xc * xc, axis=-1, keepdims=True)
    return xc * jax.lax.rsqrt(var + LN_EPS) * g + b


def _decoder_fwd_kernel(
    raw_ref, g_ref, pos_ref, mask_ref, hm_ref,
    tokw_ref, tokb_ref,
    wqkv_ref, bqkv_ref, wo_ref, bo_ref, ln1g_ref, ln1b_ref,
    w1_ref, b1_ref, w2_ref, b2_ref, ln2g_ref, ln2b_ref,
    untokw_ref, untokb_ref,
    out_ref,
):
    r, d = g_ref.shape                      # (B*N_PART, D_MODEL)
    hd = d // N_HEAD
    scale = 1.0 / (hd ** 0.5)

    # tokenizer: raw parts -> tokens
    x = jnp.dot(raw_ref[...], tokw_ref[...],
                preferred_element_type=jnp.float32) + tokb_ref[...]

    # g-token overwrite: tokens[:, 0, :] = g_sample (rows b*N_PART in collapsed layout)
    row = jax.lax.broadcasted_iota(jnp.int32, (r, d), 0)
    x = jnp.where((row % N_PART) == 0, g_ref[...], x)

    # position embedding (pos[dfn] + fa[dfn_fa], precomputed & tiled over batch)
    x = x + pos_ref[...]

    mask_add = mask_ref[...]                # (r, r) additive: 0 allowed / -1e30 masked

    for l in range(N_LAYER):
        # fused QKV projection (one MXU push)
        qkv = jnp.dot(x, wqkv_ref[l],
                      preferred_element_type=jnp.float32) + bqkv_ref[l]
        q = qkv[:, 0:d] * scale
        k = qkv[:, d:2 * d]
        v = qkv[:, 2 * d:3 * d]

        # multi-head attention via head lane-masks: no per-head slicing, no concat
        ctx = jnp.zeros_like(x)
        for h in range(N_HEAD):
            hm = hm_ref[h]                  # (1, d) — ones on head-h lanes
            # (q * hm) · k^T restricts the contraction to head h's lanes
            s = jax.lax.dot_general(
                q * hm, k, (((1,), (1,)), ((), ())),
                preferred_element_type=jnp.float32) + mask_add
            s = s - jnp.max(s, axis=-1, keepdims=True)
            p = jnp.exp(s)
            p = p * pl.reciprocal(jnp.sum(p, axis=-1, keepdims=True), approx=True)
            # head output written directly into its own lanes, accumulated
            ctx = ctx + jnp.dot(p, v * hm, preferred_element_type=jnp.float32)

        attn = jnp.dot(ctx, wo_ref[l],
                       preferred_element_type=jnp.float32) + bo_ref[l]
        x = _layer_norm(x + attn, ln1g_ref[l], ln1b_ref[l])

        h1 = jnp.dot(x, w1_ref[l], preferred_element_type=jnp.float32) + b1_ref[l]
        h1 = jnp.maximum(h1, 0.0)           # ReLU
        ff = jnp.dot(h1, w2_ref[l], preferred_element_type=jnp.float32) + b2_ref[l]
        x = _layer_norm(x + ff, ln2g_ref[l], ln2b_ref[l])

    # untokenizer on all rows (rows of interest sliced outside); 128-lane-dense store
    out_ref[...] = jnp.dot(x, untokw_ref[...],
                           preferred_element_type=jnp.float32) + untokb_ref[...]


def _fused_forward(raw2d, g_rows, pos_full, mask_add, head_mask, params):
    r = raw2d.shape[0]
    args = [
        raw2d, g_rows, pos_full, mask_add, head_mask,
        params["tok_w"], params["tok_b"],
        params["wqkv"], params["bqkv"], params["wo"], params["bo"],
        params["ln1_g"], params["ln1_b"],
        params["w1"], params["b1"], params["w2"], params["b2"],
        params["ln2_g"], params["ln2_b"],
        params["untok_w"], params["untok_b"],
    ]
    # whole-array blocks, single grid step: everything VMEM-resident for the forward
    in_specs = [
        pl.BlockSpec(a.shape, lambda i, nd=a.ndim: (0,) * nd) for a in args
    ]
    return pl.pallas_call(
        _decoder_fwd_kernel,
        out_shape=jax.ShapeDtypeStruct((r, D_OUT_PAD), jnp.float32),
        grid=(1,),
        in_specs=in_specs,
        out_specs=pl.BlockSpec((r, D_OUT_PAD), lambda i: (0, 0)),
        compiler_params=pltpu.CompilerParams(dimension_semantics=("arbitrary",)),
    )(*args)


# ----------------------------- parameter init (deterministic) -----------------------------
def _dense(key, fan_in, fan_out):
    w = jax.random.normal(key, (fan_in, fan_out), jnp.float32) * (fan_in ** -0.5)
    b = jnp.zeros((1, fan_out), jnp.float32)
    return w, b


def init_params(key):
    keys = jax.random.split(key, 8 + N_LAYER)
    params = {}
    params["tok_w"], params["tok_b"] = _dense(keys[0], D_RAW, D_MODEL)

    untok_w = jax.random.normal(keys[1], (D_MODEL, D_PART), jnp.float32) * (D_MODEL ** -0.5)
    params["untok_w"] = jnp.zeros((D_MODEL, D_OUT_PAD), jnp.float32).at[:, :D_PART].set(untok_w)
    params["untok_b"] = jnp.zeros((1, D_OUT_PAD), jnp.float32)

    params["g_mu"] = jax.random.normal(keys[2], (N_GTOK, D_MODEL), jnp.float32) * 0.1
    params["g_logvar"] = jax.random.normal(keys[3], (N_GTOK, D_MODEL), jnp.float32) * 0.1
    params["pos_emb"] = jax.random.normal(keys[4], (N_PART, D_MODEL), jnp.float32) * 0.02
    params["fa_emb"] = jax.random.normal(keys[5], (N_PART, D_MODEL), jnp.float32) * 0.02

    wqkv, wo, w1, w2 = [], [], [], []
    for li in range(N_LAYER):
        lk = jax.random.split(keys[8 + li], 6)
        wq, _ = _dense(lk[0], D_MODEL, D_MODEL)
        wk, _ = _dense(lk[1], D_MODEL, D_MODEL)
        wv, _ = _dense(lk[2], D_MODEL, D_MODEL)
        wqkv.append(jnp.concatenate([wq, wk, wv], axis=1))   # fused (D, 3D)
        wo.append(_dense(lk[3], D_MODEL, D_MODEL)[0])
        w1.append(_dense(lk[4], D_MODEL, D_FF)[0])
        w2.append(_dense(lk[5], D_FF, D_MODEL)[0])

    params["wqkv"] = jnp.stack(wqkv)                                   # (L, D, 3D)
    params["bqkv"] = jnp.zeros((N_LAYER, 1, 3 * D_MODEL), jnp.float32)
    params["wo"] = jnp.stack(wo)                                       # (L, D, D)
    params["bo"] = jnp.zeros((N_LAYER, 1, D_MODEL), jnp.float32)
    params["w1"] = jnp.stack(w1)                                       # (L, D, FF)
    params["b1"] = jnp.zeros((N_LAYER, 1, D_FF), jnp.float32)
    params["w2"] = jnp.stack(w2)                                       # (L, FF, D)
    params["b2"] = jnp.zeros((N_LAYER, 1, D_MODEL), jnp.float32)
    params["ln1_g"] = jnp.ones((N_LAYER, 1, D_MODEL), jnp.float32)
    params["ln1_b"] = jnp.zeros((N_LAYER, 1, D_MODEL), jnp.float32)
    params["ln2_g"] = jnp.ones((N_LAYER, 1, D_MODEL), jnp.float32)
    params["ln2_b"] = jnp.zeros((N_LAYER, 1, D_MODEL), jnp.float32)
    return params


# ----------------------------- forward pass (mirrors NativeDecoder.forward) -----------------------------
@jax.jit
def native_decoder_forward(index, raw_parts, params, sample_key):
    b, n_part, d_raw = raw_parts.shape
    r = b * n_part

    # g-token Gaussian embedding + reparameterized sample (tiny JAX glue, no Pallas equiv)
    mu = params["g_mu"][index]                     # (B, D)
    logvar = params["g_logvar"][index]
    std = jnp.exp(0.5 * logvar)
    eps = jax.random.normal(sample_key, (b, D_MODEL), jnp.float32)
    g_sample = mu + std * eps                      # rsample()
    g_rows = jnp.repeat(g_sample, n_part, axis=0)  # (R, D): row b*N holds batch b's sample

    # static combined position table: pos_emb[dfn] + fa_emb[dfn_fa], tiled over batch
    dfn = jnp.arange(n_part)
    dfn_fa = jnp.maximum(dfn - 1, 0)
    pos_tab = params["pos_emb"][dfn] + params["fa_emb"][dfn_fa]    # (N, D)
    pos_full = jnp.tile(pos_tab, (b, 1))                           # (R, D)

    # additive batch-block-diagonal causal mask (generate_mask, batch-collapsed)
    ridx = jnp.arange(r)
    same_b = (ridx[:, None] // n_part) == (ridx[None, :] // n_part)
    causal = (ridx[:, None] % n_part) >= (ridx[None, :] % n_part)
    mask_add = jnp.where(same_b & causal, 0.0, NEG_INF).astype(jnp.float32)

    # per-head lane masks (H, 1, D): ones on head-h's lanes
    hd = D_MODEL // N_HEAD
    lane = jnp.arange(D_MODEL)
    head_mask = jnp.stack(
        [(lane // hd == h).astype(jnp.float32)[None, :] for h in range(N_HEAD)], axis=0)

    raw2d = raw_parts.reshape(r, d_raw)

    # single fused Pallas kernel for the whole decoder forward
    out = _fused_forward(raw2d, g_rows, pos_full, mask_add, head_mask, params)

    # p-token rows (row 0 of each batch) and real untokenizer width
    part_info = out[::n_part, :D_PART]             # (B, D_PART)

    # g_token_dist returned as its (mu, std) sufficient statistics
    return part_info, (mu, std)


# ----------------------------- main -----------------------------
if __name__ == "__main__":
    root = jax.random.PRNGKey(0)
    k_param, k_raw, k_idx, k_sample = jax.random.split(root, 4)

    params = init_params(k_param)
    raw_parts = jax.random.normal(k_raw, (B, N_PART, D_RAW), jnp.float32)
    index = jax.random.randint(k_idx, (B,), 0, N_GTOK)

    part_info, (g_mu, g_std) = native_decoder_forward(index, raw_parts, params, k_sample)
    jax.block_until_ready(part_info)
    jax.block_until_ready(g_mu)
    jax.block_until_ready(g_std)

    assert part_info.shape == (B, D_PART)
    assert g_mu.shape == (B, D_MODEL) and g_std.shape == (B, D_MODEL)
    assert bool(jnp.all(jnp.isfinite(part_info)))
    assert bool(jnp.all(jnp.isfinite(g_mu))) and bool(jnp.all(jnp.isfinite(g_std)))
    print("KERNEL_OK")
</pallas_src>

<mosaic_0001>
module attributes {stable_mosaic.version = 11 : i64} {
  func.func @_decoder_fwd_kernel(%arg0: i32, %arg1: memref<16x16xf32, #tpu.memory_space<vmem>>, %arg2: memref<16x32xf32, #tpu.memory_space<vmem>>, %arg3: memref<16x32xf32, #tpu.memory_space<vmem>>, %arg4: memref<16x16xf32, #tpu.memory_space<vmem>>, %arg5: memref<4x1x32xf32, #tpu.memory_space<vmem>>, %arg6: memref<16x32xf32, #tpu.memory_space<vmem>>, %arg7: memref<1x32xf32, #tpu.memory_space<vmem>>, %arg8: memref<2x32x96xf32, #tpu.memory_space<vmem>>, %arg9: memref<2x1x96xf32, #tpu.memory_space<vmem>>, %arg10: memref<2x32x32xf32, #tpu.memory_space<vmem>>, %arg11: memref<2x1x32xf32, #tpu.memory_space<vmem>>, %arg12: memref<2x1x32xf32, #tpu.memory_space<vmem>>, %arg13: memref<2x1x32xf32, #tpu.memory_space<vmem>>, %arg14: memref<2x32x128xf32, #tpu.memory_space<vmem>>, %arg15: memref<2x1x128xf32, #tpu.memory_space<vmem>>, %arg16: memref<2x128x32xf32, #tpu.memory_space<vmem>>, %arg17: memref<2x1x32xf32, #tpu.memory_space<vmem>>, %arg18: memref<2x1x32xf32, #tpu.memory_space<vmem>>, %arg19: memref<2x1x32xf32, #tpu.memory_space<vmem>>, %arg20: memref<32x128xf32, #tpu.memory_space<vmem>>, %arg21: memref<1x128xf32, #tpu.memory_space<vmem>>, %arg22: memref<16x128xf32, #tpu.memory_space<vmem>>) attributes {dimension_semantics = [#tpu.dimension_semantics<arbitrary>], iteration_bounds = array<i64: 1>, scalar_prefetch = 0 : i64, scratch_operands = 0 : i64, tpu.core_type = #tpu.core_type<tc>, window_params = [{pipeline_mode = #tpu.pipeline_mode<synchronous>, transform_indices = @transform_0, window_bounds = array<i64: 16, 16>}, {pipeline_mode = #tpu.pipeline_mode<synchronous>, transform_indices = @transform_1, window_bounds = array<i64: 16, 32>}, {pipeline_mode = #tpu.pipeline_mode<synchronous>, transform_indices = @transform_2, window_bounds = array<i64: 16, 32>}, {pipeline_mode = #tpu.pipeline_mode<synchronous>, transform_indices = @transform_3, window_bounds = array<i64: 16, 16>}, {pipeline_mode = #tpu.pipeline_mode<synchronous>, transform_indices = @transform_4, window_bounds = array<i64: 4, 1, 32>}, {pipeline_mode = #tpu.pipeline_mode<synchronous>, transform_indices = @transform_5, window_bounds = array<i64: 16, 32>}, {pipeline_mode = #tpu.pipeline_mode<synchronous>, transform_indices = @transform_6, window_bounds = array<i64: 1, 32>}, {pipeline_mode = #tpu.pipeline_mode<synchronous>, transform_indices = @transform_7, window_bounds = array<i64: 2, 32, 96>}, {pipeline_mode = #tpu.pipeline_mode<synchronous>, transform_indices = @transform_8, window_bounds = array<i64: 2, 1, 96>}, {pipeline_mode = #tpu.pipeline_mode<synchronous>, transform_indices = @transform_9, window_bounds = array<i64: 2, 32, 32>}, {pipeline_mode = #tpu.pipeline_mode<synchronous>, transform_indices = @transform_10, window_bounds = array<i64: 2, 1, 32>}, {pipeline_mode = #tpu.pipeline_mode<synchronous>, transform_indices = @transform_11, window_bounds = array<i64: 2, 1, 32>}, {pipeline_mode = #tpu.pipeline_mode<synchronous>, transform_indices = @transform_12, window_bounds = array<i64: 2, 1, 32>}, {pipeline_mode = #tpu.pipeline_mode<synchronous>, transform_indices = @transform_13, window_bounds = array<i64: 2, 32, 128>}, {pipeline_mode = #tpu.pipeline_mode<synchronous>, transform_indices = @transform_14, window_bounds = array<i64: 2, 1, 128>}, {pipeline_mode = #tpu.pipeline_mode<synchronous>, transform_indices = @transform_15, window_bounds = array<i64: 2, 128, 32>}, {pipeline_mode = #tpu.pipeline_mode<synchronous>, transform_indices = @transform_16, window_bounds = array<i64: 2, 1, 32>}, {pipeline_mode = #tpu.pipeline_mode<synchronous>, transform_indices = @transform_17, window_bounds = array<i64: 2, 1, 32>}, {pipeline_mode = #tpu.pipeline_mode<synchronous>, transform_indices = @transform_18, window_bounds = array<i64: 2, 1, 32>}, {pipeline_mode = #tpu.pipeline_mode<synchronous>, transform_indices = @transform_19, window_bounds = array<i64: 32, 128>}, {pipeline_mode = #tpu.pipeline_mode<synchronous>, transform_indices = @transform_20, window_bounds = array<i64: 1, 128>}, {pipeline_mode = #tpu.pipeline_mode<synchronous>, transform_indices = @transform_21, window_bounds = array<i64: 16, 128>}]} {
    %c0 = arith.constant 0 : index
    %c0_0 = arith.constant 0 : index
    %0 = vector.load %arg1[%c0, %c0_0] : memref<16x16xf32, #tpu.memory_space<vmem>>, vector<16x16xf32>
    %c0_1 = arith.constant 0 : index
    %c0_2 = arith.constant 0 : index
    %1 = vector.load %arg6[%c0_1, %c0_2] : memref<16x32xf32, #tpu.memory_space<vmem>>, vector<16x32xf32>
    %cst = arith.constant dense<0.000000e+00> : vector<16x32xf32>
    %2 = tpu.matmul %0, %1, %cst {dimension_numbers = #tpu.dot_dimension_numbers<[1], [0], [0], [1], [0, 0, 1, 1], [], []>} : vector<16x16xf32>, vector<16x32xf32>, vector<16x32xf32> -> vector<16x32xf32>
    %c0_3 = arith.constant 0 : index
    %c0_4 = arith.constant 0 : index
    %3 = vector.load %arg7[%c0_3, %c0_4] : memref<1x32xf32, #tpu.memory_space<vmem>>, vector<1x32xf32>
    %4 = vector.broadcast %3 : vector<1x32xf32> to vector<16x32xf32>
    %5 = arith.addf %2, %4 : vector<16x32xf32>
    %6 = tpu.iota {dimensions = array<i32: 0>} : vector<16x32xi32>
    %c8_i32 = arith.constant 8 : i32
    %c0_i32 = arith.constant 0 : i32
    %7 = arith.cmpi eq, %c8_i32, %c0_i32 : i32
    %c1_i32 = arith.constant 1 : i32
    %8 = arith.select %7, %c1_i32, %c8_i32 : i32
    %9 = vector.broadcast %8 : i32 to vector<16x32xi32>
    %10 = arith.remsi %6, %9 : vector<16x32xi32>
    %c0_i32_5 = arith.constant 0 : i32
    %11 = vector.broadcast %c0_i32_5 : i32 to vector<16x32xi32>
    %12 = arith.cmpi ne, %10, %11 : vector<16x32xi32>
    %c0_i32_6 = arith.constant 0 : i32
    %13 = vector.broadcast %c0_i32_6 : i32 to vector<16x32xi32>
    %14 = arith.cmpi slt, %10, %13 : vector<16x32xi32>
    %c0_i32_7 = arith.constant 0 : i32
    %15 = arith.cmpi slt, %8, %c0_i32_7 : i32
    %16 = vector.broadcast %15 : i1 to vector<16x32xi1>
    %17 = vector.broadcast %16 : vector<16x32xi1> to vector<16x32xi1>
    %18 = arith.xori %14, %17 : vector<16x32xi1>
    %19 = arith.andi %18, %12 : vector<16x32xi1>
    %20 = vector.broadcast %8 : i32 to vector<16x32xi32>
    %21 = arith.addi %10, %20 : vector<16x32xi32>
    %22 = arith.select %19, %21, %10 : vector<16x32xi1>, vector<16x32xi32>
    %c0_i32_8 = arith.constant 0 : i32
    %23 = vector.broadcast %c0_i32_8 : i32 to vector<16x32xi32>
    %24 = arith.cmpi eq, %22, %23 : vector<16x32xi32>
    %c0_9 = arith.constant 0 : index
    %c0_10 = arith.constant 0 : index
    %25 = vector.load %arg2[%c0_9, %c0_10] : memref<16x32xf32, #tpu.memory_space<vmem>>, vector<16x32xf32>
    %26 = arith.select %24, %25, %5 : vector<16x32xi1>, vector<16x32xf32>
    %c0_11 = arith.constant 0 : index
    %c0_12 = arith.constant 0 : index
    %27 = vector.load %arg3[%c0_11, %c0_12] : memref<16x32xf32, #tpu.memory_space<vmem>>, vector<16x32xf32>
    %28 = arith.addf %26, %27 : vector<16x32xf32>
    %c0_13 = arith.constant 0 : index
    %c0_14 = arith.constant 0 : index
    %29 = vector.load %arg4[%c0_13, %c0_14] : memref<16x16xf32, #tpu.memory_space<vmem>>, vector<16x16xf32>
    %c0_15 = arith.constant 0 : index
    %c0_16 = arith.constant 0 : index
    %c0_17 = arith.constant 0 : index
    %30 = vector.load %arg8[%c0_15, %c0_16, %c0_17] : memref<2x32x96xf32, #tpu.memory_space<vmem>>, vector<1x32x96xf32>
    %31 = vector.shape_cast %30 : vector<1x32x96xf32> to vector<32x96xf32>
    %cst_18 = arith.constant dense<0.000000e+00> : vector<16x96xf32>
    %32 = tpu.matmul %28, %31, %cst_18 {dimension_numbers = #tpu.dot_dimension_numbers<[1], [0], [0], [1], [0, 0, 1, 1], [], []>} : vector<16x32xf32>, vector<32x96xf32>, vector<16x96xf32> -> vector<16x96xf32>
    %c0_19 = arith.constant 0 : index
    %c0_20 = arith.constant 0 : index
    %c0_21 = arith.constant 0 : index
    %33 = vector.load %arg9[%c0_19, %c0_20, %c0_21] : memref<2x1x96xf32, #tpu.memory_space<vmem>>, vector<1x1x96xf32>
    %34 = vector.shape_cast %33 : vector<1x1x96xf32> to vector<1x96xf32>
    %35 = vector.broadcast %34 : vector<1x96xf32> to vector<16x96xf32>
    %36 = arith.addf %32, %35 : vector<16x96xf32>
    %37 = vector.extract_strided_slice %36 {offsets = [0, 0], sizes = [16, 32], strides = [1, 1]} : vector<16x96xf32> to vector<16x32xf32>
    %cst_22 = arith.constant 0.353553385 : f32
    %38 = vector.broadcast %cst_22 : f32 to vector<16x32xf32>
    %39 = arith.mulf %37, %38 : vector<16x32xf32>
    %40 = vector.extract_strided_slice %36 {offsets = [0, 32], sizes = [16, 32], strides = [1, 1]} : vector<16x96xf32> to vector<16x32xf32>
    %41 = vector.extract_strided_slice %36 {offsets = [0, 64], sizes = [16, 32], strides = [1, 1]} : vector<16x96xf32> to vector<16x32xf32>
    %cst_23 = arith.constant 0.000000e+00 : f32
    %42 = vector.broadcast %cst_23 : f32 to vector<16x32xf32>
    %c0_24 = arith.constant 0 : index
    %c0_25 = arith.constant 0 : index
    %c0_26 = arith.constant 0 : index
    %43 = vector.load %arg5[%c0_24, %c0_25, %c0_26] : memref<4x1x32xf32, #tpu.memory_space<vmem>>, vector<1x1x32xf32>
    %44 = vector.shape_cast %43 : vector<1x1x32xf32> to vector<1x32xf32>
    %45 = vector.broadcast %44 : vector<1x32xf32> to vector<16x32xf32>
    %46 = arith.mulf %39, %45 : vector<16x32xf32>
    %cst_27 = arith.constant dense<0.000000e+00> : vector<16x16xf32>
    %47 = tpu.matmul %46, %40, %cst_27 {dimension_numbers = #tpu.dot_dimension_numbers<[1], [1], [0], [0], [0, 0, 1, 0], [], []>} : vector<16x32xf32>, vector<16x32xf32>, vector<16x16xf32> -> vector<16x16xf32>
    %48 = arith.addf %47, %29 : vector<16x16xf32>
    %cst_28 = arith.constant dense<0xFF800000> : vector<16xf32>
    %49 = vector.multi_reduction <maximumf>, %48, %cst_28 [1] : vector<16x16xf32> to vector<16xf32>
    %50 = vector.shape_cast %49 : vector<16xf32> to vector<16x1xf32>
    %51 = vector.broadcast %50 : vector<16x1xf32> to vector<16x16xf32>
    %52 = arith.subf %48, %51 : vector<16x16xf32>
    %53 = math.exp %52 : vector<16x16xf32>
    %cst_29 = arith.constant dense<0.000000e+00> : vector<16xf32>
    %54 = vector.multi_reduction <add>, %53, %cst_29 [1] : vector<16x16xf32> to vector<16xf32>
    %55 = vector.shape_cast %54 : vector<16xf32> to vector<16x1xf32>
    %56 = tpu.reciprocal %55 {approx = true} : vector<16x1xf32> -> vector<16x1xf32>
    %57 = vector.broadcast %56 : vector<16x1xf32> to vector<16x16xf32>
    %58 = arith.mulf %53, %57 : vector<16x16xf32>
    %59 = vector.broadcast %44 : vector<1x32xf32> to vector<16x32xf32>
    %60 = arith.mulf %41, %59 : vector<16x32xf32>
    %cst_30 = arith.constant dense<0.000000e+00> : vector<16x32xf32>
    %61 = tpu.matmul %58, %60, %cst_30 {dimension_numbers = #tpu.dot_dimension_numbers<[1], [0], [0], [1], [0, 0, 1, 1], [], []>} : vector<16x16xf32>, vector<16x32xf32>, vector<16x32xf32> -> vector<16x32xf32>
    %62 = arith.addf %42, %61 : vector<16x32xf32>
    %c1 = arith.constant 1 : index
    %c0_31 = arith.constant 0 : index
    %c0_32 = arith.constant 0 : index
    %63 = vector.load %arg5[%c1, %c0_31, %c0_32] : memref<4x1x32xf32, #tpu.memory_space<vmem>>, vector<1x1x32xf32>
    %64 = vector.shape_cast %63 : vector<1x1x32xf32> to vector<1x32xf32>
    %65 = vector.broadcast %64 : vector<1x32xf32> to vector<16x32xf32>
    %66 = arith.mulf %39, %65 : vector<16x32xf32>
    %cst_33 = arith.constant dense<0.000000e+00> : vector<16x16xf32>
    %67 = tpu.matmul %66, %40, %cst_33 {dimension_numbers = #tpu.dot_dimension_numbers<[1], [1], [0], [0], [0, 0, 1, 0], [], []>} : vector<16x32xf32>, vector<16x32xf32>, vector<16x16xf32> -> vector<16x16xf32>
    %68 = arith.addf %67, %29 : vector<16x16xf32>
    %cst_34 = arith.constant dense<0xFF800000> : vector<16xf32>
    %69 = vector.multi_reduction <maximumf>, %68, %cst_34 [1] : vector<16x16xf32> to vector<16xf32>
    %70 = vector.shape_cast %69 : vector<16xf32> to vector<16x1xf32>
    %71 = vector.broadcast %70 : vector<16x1xf32> to vector<16x16xf32>
    %72 = arith.subf %68, %71 : vector<16x16xf32>
    %73 = math.exp %72 : vector<16x16xf32>
    %cst_35 = arith.constant dense<0.000000e+00> : vector<16xf32>
    %74 = vector.multi_reduction <add>, %73, %cst_35 [1] : vector<16x16xf32> to vector<16xf32>
    %75 = vector.shape_cast %74 : vector<16xf32> to vector<16x1xf32>
    %76 = tpu.reciprocal %75 {approx = true} : vector<16x1xf32> -> vector<16x1xf32>
    %77 = vector.broadcast %76 : vector<16x1xf32> to vector<16x16xf32>
    %78 = arith.mulf %73, %77 : vector<16x16xf32>
    %79 = vector.broadcast %64 : vector<1x32xf32> to vector<16x32xf32>
    %80 = arith.mulf %41, %79 : vector<16x32xf32>
    %cst_36 = arith.constant dense<0.000000e+00> : vector<16x32xf32>
    %81 = tpu.matmul %78, %80, %cst_36 {dimension_numbers = #tpu.dot_dimension_numbers<[1], [0], [0], [1], [0, 0, 1, 1], [], []>} : vector<16x16xf32>, vector<16x32xf32>, vector<16x32xf32> -> vector<16x32xf32>
    %82 = arith.addf %62, %81 : vector<16x32xf32>
    %c2 = arith.constant 2 : index
    %c0_37 = arith.constant 0 : index
    %c0_38 = arith.constant 0 : index
    %83 = vector.load %arg5[%c2, %c0_37, %c0_38] : memref<4x1x32xf32, #tpu.memory_space<vmem>>, vector<1x1x32xf32>
    %84 = vector.shape_cast %83 : vector<1x1x32xf32> to vector<1x32xf32>
    %85 = vector.broadcast %84 : vector<1x32xf32> to vector<16x32xf32>
    %86 = arith.mulf %39, %85 : vector<16x32xf32>
    %cst_39 = arith.constant dense<0.000000e+00> : vector<16x16xf32>
    %87 = tpu.matmul %86, %40, %cst_39 {dimension_numbers = #tpu.dot_dimension_numbers<[1], [1], [0], [0], [0, 0, 1, 0], [], []>} : vector<16x32xf32>, vector<16x32xf32>, vector<16x16xf32> -> vector<16x16xf32>
    %88 = arith.addf %87, %29 : vector<16x16xf32>
    %cst_40 = arith.constant dense<0xFF800000> : vector<16xf32>
    %89 = vector.multi_reduction <maximumf>, %88, %cst_40 [1] : vector<16x16xf32> to vector<16xf32>
    %90 = vector.shape_cast %89 : vector<16xf32> to vector<16x1xf32>
    %91 = vector.broadcast %90 : vector<16x1xf32> to vector<16x16xf32>
    %92 = arith.subf %88, %91 : vector<16x16xf32>
    %93 = math.exp %92 : vector<16x16xf32>
    %cst_41 = arith.constant dense<0.000000e+00> : vector<16xf32>
    %94 = vector.multi_reduction <add>, %93, %cst_41 [1] : vector<16x16xf32> to vector<16xf32>
    %95 = vector.shape_cast %94 : vector<16xf32> to vector<16x1xf32>
    %96 = tpu.reciprocal %95 {approx = true} : vector<16x1xf32> -> vector<16x1xf32>
    %97 = vector.broadcast %96 : vector<16x1xf32> to vector<16x16xf32>
    %98 = arith.mulf %93, %97 : vector<16x16xf32>
    %99 = vector.broadcast %84 : vector<1x32xf32> to vector<16x32xf32>
    %100 = arith.mulf %41, %99 : vector<16x32xf32>
    %cst_42 = arith.constant dense<0.000000e+00> : vector<16x32xf32>
    %101 = tpu.matmul %98, %100, %cst_42 {dimension_numbers = #tpu.dot_dimension_numbers<[1], [0], [0], [1], [0, 0, 1, 1], [], []>} : vector<16x16xf32>, vector<16x32xf32>, vector<16x32xf32> -> vector<16x32xf32>
    %102 = arith.addf %82, %101 : vector<16x32xf32>
    %c3 = arith.constant 3 : index
    %c0_43 = arith.constant 0 : index
    %c0_44 = arith.constant 0 : index
    %103 = vector.load %arg5[%c3, %c0_43, %c0_44] : memref<4x1x32xf32, #tpu.memory_space<vmem>>, vector<1x1x32xf32>
    %104 = vector.shape_cast %103 : vector<1x1x32xf32> to vector<1x32xf32>
    %105 = vector.broadcast %104 : vector<1x32xf32> to vector<16x32xf32>
    %106 = arith.mulf %39, %105 : vector<16x32xf32>
    %cst_45 = arith.constant dense<0.000000e+00> : vector<16x16xf32>
    %107 = tpu.matmul %106, %40, %cst_45 {dimension_numbers = #tpu.dot_dimension_numbers<[1], [1], [0], [0], [0, 0, 1, 0], [], []>} : vector<16x32xf32>, vector<16x32xf32>, vector<16x16xf32> -> vector<16x16xf32>
    %108 = arith.addf %107, %29 : vector<16x16xf32>
    %cst_46 = arith.constant dense<0xFF800000> : vector<16xf32>
    %109 = vector.multi_reduction <maximumf>, %108, %cst_46 [1] : vector<16x16xf32> to vector<16xf32>
    %110 = vector.shape_cast %109 : vector<16xf32> to vector<16x1xf32>
    %111 = vector.broadcast %110 : vector<16x1xf32> to vector<16x16xf32>
    %112 = arith.subf %108, %111 : vector<16x16xf32>
    %113 = math.exp %112 : vector<16x16xf32>
    %cst_47 = arith.constant dense<0.000000e+00> : vector<16xf32>
    %114 = vector.multi_reduction <add>, %113, %cst_47 [1] : vector<16x16xf32> to vector<16xf32>
    %115 = vector.shape_cast %114 : vector<16xf32> to vector<16x1xf32>
    %116 = tpu.reciprocal %115 {approx = true} : vector<16x1xf32> -> vector<16x1xf32>
    %117 = vector.broadcast %116 : vector<16x1xf32> to vector<16x16xf32>
    %118 = arith.mulf %113, %117 : vector<16x16xf32>
    %119 = vector.broadcast %104 : vector<1x32xf32> to vector<16x32xf32>
    %120 = arith.mulf %41, %119 : vector<16x32xf32>
    %cst_48 = arith.constant dense<0.000000e+00> : vector<16x32xf32>
    %121 = tpu.matmul %118, %120, %cst_48 {dimension_numbers = #tpu.dot_dimension_numbers<[1], [0], [0], [1], [0, 0, 1, 1], [], []>} : vector<16x16xf32>, vector<16x32xf32>, vector<16x32xf32> -> vector<16x32xf32>
    %122 = arith.addf %102, %121 : vector<16x32xf32>
    %c0_49 = arith.constant 0 : index
    %c0_50 = arith.constant 0 : index
    %c0_51 = arith.constant 0 : index
    %123 = vector.load %arg10[%c0_49, %c0_50, %c0_51] : memref<2x32x32xf32, #tpu.memory_space<vmem>>, vector<1x32x32xf32>
    %124 = vector.shape_cast %123 : vector<1x32x32xf32> to vector<32x32xf32>
    %cst_52 = arith.constant dense<0.000000e+00> : vector<16x32xf32>
    %125 = tpu.matmul %122, %124, %cst_52 {dimension_numbers = #tpu.dot_dimension_numbers<[1], [0], [0], [1], [0, 0, 1, 1], [], []>} : vector<16x32xf32>, vector<32x32xf32>, vector<16x32xf32> -> vector<16x32xf32>
    %c0_53 = arith.constant 0 : index
    %c0_54 = arith.constant 0 : index
    %c0_55 = arith.constant 0 : index
    %126 = vector.load %arg11[%c0_53, %c0_54, %c0_55] : memref<2x1x32xf32, #tpu.memory_space<vmem>>, vector<1x1x32xf32>
    %127 = vector.shape_cast %126 : vector<1x1x32xf32> to vector<1x32xf32>
    %128 = vector.broadcast %127 : vector<1x32xf32> to vector<16x32xf32>
    %129 = arith.addf %125, %128 : vector<16x32xf32>
    %130 = arith.addf %28, %129 : vector<16x32xf32>
    %c0_56 = arith.constant 0 : index
    %c0_57 = arith.constant 0 : index
    %c0_58 = arith.constant 0 : index
    %131 = vector.load %arg12[%c0_56, %c0_57, %c0_58] : memref<2x1x32xf32, #tpu.memory_space<vmem>>, vector<1x1x32xf32>
    %132 = vector.shape_cast %131 : vector<1x1x32xf32> to vector<1x32xf32>
    %c0_59 = arith.constant 0 : index
    %c0_60 = arith.constant 0 : index
    %c0_61 = arith.constant 0 : index
    %133 = vector.load %arg13[%c0_59, %c0_60, %c0_61] : memref<2x1x32xf32, #tpu.memory_space<vmem>>, vector<1x1x32xf32>
    %134 = vector.shape_cast %133 : vector<1x1x32xf32> to vector<1x32xf32>
    %cst_62 = arith.constant dense<0.000000e+00> : vector<16xf32>
    %135 = vector.multi_reduction <add>, %130, %cst_62 [1] : vector<16x32xf32> to vector<16xf32>
    %136 = vector.shape_cast %135 : vector<16xf32> to vector<16x1xf32>
    %cst_63 = arith.constant 3.200000e+01 : f32
    %137 = vector.broadcast %cst_63 : f32 to vector<16x1xf32>
    %138 = arith.divf %136, %137 : vector<16x1xf32>
    %139 = vector.broadcast %138 : vector<16x1xf32> to vector<16x32xf32>
    %140 = arith.subf %130, %139 : vector<16x32xf32>
    %141 = arith.mulf %140, %140 : vector<16x32xf32>
    %cst_64 = arith.constant dense<0.000000e+00> : vector<16xf32>
    %142 = vector.multi_reduction <add>, %141, %cst_64 [1] : vector<16x32xf32> to vector<16xf32>
    %143 = vector.shape_cast %142 : vector<16xf32> to vector<16x1xf32>
    %cst_65 = arith.constant 3.200000e+01 : f32
    %144 = vector.broadcast %cst_65 : f32 to vector<16x1xf32>
    %145 = arith.divf %143, %144 : vector<16x1xf32>
    %cst_66 = arith.constant 9.99999974E-6 : f32
    %146 = vector.broadcast %cst_66 : f32 to vector<16x1xf32>
    %147 = arith.addf %145, %146 : vector<16x1xf32>
    %148 = math.rsqrt %147 : vector<16x1xf32>
    %149 = vector.broadcast %148 : vector<16x1xf32> to vector<16x32xf32>
    %150 = arith.mulf %140, %149 : vector<16x32xf32>
    %151 = vector.broadcast %132 : vector<1x32xf32> to vector<16x32xf32>
    %152 = arith.mulf %150, %151 : vector<16x32xf32>
    %153 = vector.broadcast %134 : vector<1x32xf32> to vector<16x32xf32>
    %154 = arith.addf %152, %153 : vector<16x32xf32>
    %c0_67 = arith.constant 0 : index
    %c0_68 = arith.constant 0 : index
    %c0_69 = arith.constant 0 : index
    %155 = vector.load %arg14[%c0_67, %c0_68, %c0_69] : memref<2x32x128xf32, #tpu.memory_space<vmem>>, vector<1x32x128xf32>
    %156 = vector.shape_cast %155 : vector<1x32x128xf32> to vector<32x128xf32>
    %cst_70 = arith.constant dense<0.000000e+00> : vector<16x128xf32>
    %157 = tpu.matmul %154, %156, %cst_70 {dimension_numbers = #tpu.dot_dimension_numbers<[1], [0], [0], [1], [0, 0, 1, 1], [], []>} : vector<16x32xf32>, vector<32x128xf32>, vector<16x128xf32> -> vector<16x128xf32>
    %c0_71 = arith.constant 0 : index
    %c0_72 = arith.constant 0 : index
    %c0_73 = arith.constant 0 : index
    %158 = vector.load %arg15[%c0_71, %c0_72, %c0_73] : memref<2x1x128xf32, #tpu.memory_space<vmem>>, vector<1x1x128xf32>
    %159 = vector.shape_cast %158 : vector<1x1x128xf32> to vector<1x128xf32>
    %160 = vector.broadcast %159 : vector<1x128xf32> to vector<16x128xf32>
    %161 = arith.addf %157, %160 : vector<16x128xf32>
    %cst_74 = arith.constant 0.000000e+00 : f32
    %162 = vector.broadcast %cst_74 : f32 to vector<16x128xf32>
    %163 = arith.maximumf %161, %162 : vector<16x128xf32>
    %c0_75 = arith.constant 0 : index
    %c0_76 = arith.constant 0 : index
    %c0_77 = arith.constant 0 : index
    %164 = vector.load %arg16[%c0_75, %c0_76, %c0_77] : memref<2x128x32xf32, #tpu.memory_space<vmem>>, vector<1x128x32xf32>
    %165 = vector.shape_cast %164 : vector<1x128x32xf32> to vector<128x32xf32>
    %cst_78 = arith.constant dense<0.000000e+00> : vector<16x32xf32>
    %166 = tpu.matmul %163, %165, %cst_78 {dimension_numbers = #tpu.dot_dimension_numbers<[1], [0], [0], [1], [0, 0, 1, 1], [], []>} : vector<16x128xf32>, vector<128x32xf32>, vector<16x32xf32> -> vector<16x32xf32>
    %c0_79 = arith.constant 0 : index
    %c0_80 = arith.constant 0 : index
    %c0_81 = arith.constant 0 : index
    %167 = vector.load %arg17[%c0_79, %c0_80, %c0_81] : memref<2x1x32xf32, #tpu.memory_space<vmem>>, vector<1x1x32xf32>
    %168 = vector.shape_cast %167 : vector<1x1x32xf32> to vector<1x32xf32>
    %169 = vector.broadcast %168 : vector<1x32xf32> to vector<16x32xf32>
    %170 = arith.addf %166, %169 : vector<16x32xf32>
    %171 = arith.addf %154, %170 : vector<16x32xf32>
    %c0_82 = arith.constant 0 : index
    %c0_83 = arith.constant 0 : index
    %c0_84 = arith.constant 0 : index
    %172 = vector.load %arg18[%c0_82, %c0_83, %c0_84] : memref<2x1x32xf32, #tpu.memory_space<vmem>>, vector<1x1x32xf32>
    %173 = vector.shape_cast %172 : vector<1x1x32xf32> to vector<1x32xf32>
    %c0_85 = arith.constant 0 : index
    %c0_86 = arith.constant 0 : index
    %c0_87 = arith.constant 0 : index
    %174 = vector.load %arg19[%c0_85, %c0_86, %c0_87] : memref<2x1x32xf32, #tpu.memory_space<vmem>>, vector<1x1x32xf32>
    %175 = vector.shape_cast %174 : vector<1x1x32xf32> to vector<1x32xf32>
    %cst_88 = arith.constant dense<0.000000e+00> : vector<16xf32>
    %176 = vector.multi_reduction <add>, %171, %cst_88 [1] : vector<16x32xf32> to vector<16xf32>
    %177 = vector.shape_cast %176 : vector<16xf32> to vector<16x1xf32>
    %cst_89 = arith.constant 3.200000e+01 : f32
    %178 = vector.broadcast %cst_89 : f32 to vector<16x1xf32>
    %179 = arith.divf %177, %178 : vector<16x1xf32>
    %180 = vector.broadcast %179 : vector<16x1xf32> to vector<16x32xf32>
    %181 = arith.subf %171, %180 : vector<16x32xf32>
    %182 = arith.mulf %181, %181 : vector<16x32xf32>
    %cst_90 = arith.constant dense<0.000000e+00> : vector<16xf32>
    %183 = vector.multi_reduction <add>, %182, %cst_90 [1] : vector<16x32xf32> to vector<16xf32>
    %184 = vector.shape_cast %183 : vector<16xf32> to vector<16x1xf32>
    %cst_91 = arith.constant 3.200000e+01 : f32
    %185 = vector.broadcast %cst_91 : f32 to vector<16x1xf32>
    %186 = arith.divf %184, %185 : vector<16x1xf32>
    %cst_92 = arith.constant 9.99999974E-6 : f32
    %187 = vector.broadcast %cst_92 : f32 to vector<16x1xf32>
    %188 = arith.addf %186, %187 : vector<16x1xf32>
    %189 = math.rsqrt %188 : vector<16x1xf32>
    %190 = vector.broadcast %189 : vector<16x1xf32> to vector<16x32xf32>
    %191 = arith.mulf %181, %190 : vector<16x32xf32>
    %192 = vector.broadcast %173 : vector<1x32xf32> to vector<16x32xf32>
    %193 = arith.mulf %191, %192 : vector<16x32xf32>
    %194 = vector.broadcast %175 : vector<1x32xf32> to vector<16x32xf32>
    %195 = arith.addf %193, %194 : vector<16x32xf32>
    %c1_93 = arith.constant 1 : index
    %c0_94 = arith.constant 0 : index
    %c0_95 = arith.constant 0 : index
    %196 = vector.load %arg8[%c1_93, %c0_94, %c0_95] : memref<2x32x96xf32, #tpu.memory_space<vmem>>, vector<1x32x96xf32>
    %197 = vector.shape_cast %196 : vector<1x32x96xf32> to vector<32x96xf32>
    %cst_96 = arith.constant dense<0.000000e+00> : vector<16x96xf32>
    %198 = tpu.matmul %195, %197, %cst_96 {dimension_numbers = #tpu.dot_dimension_numbers<[1], [0], [0], [1], [0, 0, 1, 1], [], []>} : vector<16x32xf32>, vector<32x96xf32>, vector<16x96xf32> -> vector<16x96xf32>
    %c1_97 = arith.constant 1 : index
    %c0_98 = arith.constant 0 : index
    %c0_99 = arith.constant 0 : index
    %199 = vector.load %arg9[%c1_97, %c0_98, %c0_99] : memref<2x1x96xf32, #tpu.memory_space<vmem>>, vector<1x1x96xf32>
    %200 = vector.shape_cast %199 : vector<1x1x96xf32> to vector<1x96xf32>
    %201 = vector.broadcast %200 : vector<1x96xf32> to vector<16x96xf32>
    %202 = arith.addf %198, %201 : vector<16x96xf32>
    %203 = vector.extract_strided_slice %202 {offsets = [0, 0], sizes = [16, 32], strides = [1, 1]} : vector<16x96xf32> to vector<16x32xf32>
    %cst_100 = arith.constant 0.353553385 : f32
    %204 = vector.broadcast %cst_100 : f32 to vector<16x32xf32>
    %205 = arith.mulf %203, %204 : vector<16x32xf32>
    %206 = vector.extract_strided_slice %202 {offsets = [0, 32], sizes = [16, 32], strides = [1, 1]} : vector<16x96xf32> to vector<16x32xf32>
    %207 = vector.extract_strided_slice %202 {offsets = [0, 64], sizes = [16, 32], strides = [1, 1]} : vector<16x96xf32> to vector<16x32xf32>
    %cst_101 = arith.constant 0.000000e+00 : f32
    %208 = vector.broadcast %cst_101 : f32 to vector<16x32xf32>
    %c0_102 = arith.constant 0 : index
    %c0_103 = arith.constant 0 : index
    %c0_104 = arith.constant 0 : index
    %209 = vector.load %arg5[%c0_102, %c0_103, %c0_104] : memref<4x1x32xf32, #tpu.memory_space<vmem>>, vector<1x1x32xf32>
    %210 = vector.shape_cast %209 : vector<1x1x32xf32> to vector<1x32xf32>
    %211 = vector.broadcast %210 : vector<1x32xf32> to vector<16x32xf32>
    %212 = arith.mulf %205, %211 : vector<16x32xf32>
    %cst_105 = arith.constant dense<0.000000e+00> : vector<16x16xf32>
    %213 = tpu.matmul %212, %206, %cst_105 {dimension_numbers = #tpu.dot_dimension_numbers<[1], [1], [0], [0], [0, 0, 1, 0], [], []>} : vector<16x32xf32>, vector<16x32xf32>, vector<16x16xf32> -> vector<16x16xf32>
    %214 = arith.addf %213, %29 : vector<16x16xf32>
    %cst_106 = arith.constant dense<0xFF800000> : vector<16xf32>
    %215 = vector.multi_reduction <maximumf>, %214, %cst_106 [1] : vector<16x16xf32> to vector<16xf32>
    %216 = vector.shape_cast %215 : vector<16xf32> to vector<16x1xf32>
    %217 = vector.broadcast %216 : vector<16x1xf32> to vector<16x16xf32>
    %218 = arith.subf %214, %217 : vector<16x16xf32>
    %219 = math.exp %218 : vector<16x16xf32>
    %cst_107 = arith.constant dense<0.000000e+00> : vector<16xf32>
    %220 = vector.multi_reduction <add>, %219, %cst_107 [1] : vector<16x16xf32> to vector<16xf32>
    %221 = vector.shape_cast %220 : vector<16xf32> to vector<16x1xf32>
    %222 = tpu.reciprocal %221 {approx = true} : vector<16x1xf32> -> vector<16x1xf32>
    %223 = vector.broadcast %222 : vector<16x1xf32> to vector<16x16xf32>
    %224 = arith.mulf %219, %223 : vector<16x16xf32>
    %225 = vector.broadcast %210 : vector<1x32xf32> to vector<16x32xf32>
    %226 = arith.mulf %207, %225 : vector<16x32xf32>
    %cst_108 = arith.constant dense<0.000000e+00> : vector<16x32xf32>
    %227 = tpu.matmul %224, %226, %cst_108 {dimension_numbers = #tpu.dot_dimension_numbers<[1], [0], [0], [1], [0, 0, 1, 1], [], []>} : vector<16x16xf32>, vector<16x32xf32>, vector<16x32xf32> -> vector<16x32xf32>
    %228 = arith.addf %208, %227 : vector<16x32xf32>
    %c1_109 = arith.constant 1 : index
    %c0_110 = arith.constant 0 : index
    %c0_111 = arith.constant 0 : index
    %229 = vector.load %arg5[%c1_109, %c0_110, %c0_111] : memref<4x1x32xf32, #tpu.memory_space<vmem>>, vector<1x1x32xf32>
    %230 = vector.shape_cast %229 : vector<1x1x32xf32> to vector<1x32xf32>
    %231 = vector.broadcast %230 : vector<1x32xf32> to vector<16x32xf32>
    %232 = arith.mulf %205, %231 : vector<16x32xf32>
    %cst_112 = arith.constant dense<0.000000e+00> : vector<16x16xf32>
    %233 = tpu.matmul %232, %206, %cst_112 {dimension_numbers = #tpu.dot_dimension_numbers<[1], [1], [0], [0], [0, 0, 1, 0], [], []>} : vector<16x32xf32>, vector<16x32xf32>, vector<16x16xf32> -> vector<16x16xf32>
    %234 = arith.addf %233, %29 : vector<16x16xf32>
    %cst_113 = arith.constant dense<0xFF800000> : vector<16xf32>
    %235 = vector.multi_reduction <maximumf>, %234, %cst_113 [1] : vector<16x16xf32> to vector<16xf32>
    %236 = vector.shape_cast %235 : vector<16xf32> to vector<16x1xf32>
    %237 = vector.broadcast %236 : vector<16x1xf32> to vector<16x16xf32>
    %238 = arith.subf %234, %237 : vector<16x16xf32>
    %239 = math.exp %238 : vector<16x16xf32>
    %cst_114 = arith.constant dense<0.000000e+00> : vector<16xf32>
    %240 = vector.multi_reduction <add>, %239, %cst_114 [1] : vector<16x16xf32> to vector<16xf32>
    %241 = vector.shape_cast %240 : vector<16xf32> to vector<16x1xf32>
    %242 = tpu.reciprocal %241 {approx = true} : vector<16x1xf32> -> vector<16x1xf32>
    %243 = vector.broadcast %242 : vector<16x1xf32> to vector<16x16xf32>
    %244 = arith.mulf %239, %243 : vector<16x16xf32>
    %245 = vector.broadcast %230 : vector<1x32xf32> to vector<16x32xf32>
    %246 = arith.mulf %207, %245 : vector<16x32xf32>
    %cst_115 = arith.constant dense<0.000000e+00> : vector<16x32xf32>
    %247 = tpu.matmul %244, %246, %cst_115 {dimension_numbers = #tpu.dot_dimension_numbers<[1], [0], [0], [1], [0, 0, 1, 1], [], []>} : vector<16x16xf32>, vector<16x32xf32>, vector<16x32xf32> -> vector<16x32xf32>
    %248 = arith.addf %228, %247 : vector<16x32xf32>
    %c2_116 = arith.constant 2 : index
    %c0_117 = arith.constant 0 : index
    %c0_118 = arith.constant 0 : index
    %249 = vector.load %arg5[%c2_116, %c0_117, %c0_118] : memref<4x1x32xf32, #tpu.memory_space<vmem>>, vector<1x1x32xf32>
    %250 = vector.shape_cast %249 : vector<1x1x32xf32> to vector<1x32xf32>
    %251 = vector.broadcast %250 : vector<1x32xf32> to vector<16x32xf32>
    %252 = arith.mulf %205, %251 : vector<16x32xf32>
    %cst_119 = arith.constant dense<0.000000e+00> : vector<16x16xf32>
    %253 = tpu.matmul %252, %206, %cst_119 {dimension_numbers = #tpu.dot_dimension_numbers<[1], [1], [0], [0], [0, 0, 1, 0], [], []>} : vector<16x32xf32>, vector<16x32xf32>, vector<16x16xf32> -> vector<16x16xf32>
    %254 = arith.addf %253, %29 : vector<16x16xf32>
    %cst_120 = arith.constant dense<0xFF800000> : vector<16xf32>
    %255 = vector.multi_reduction <maximumf>, %254, %cst_120 [1] : vector<16x16xf32> to vector<16xf32>
    %256 = vector.shape_cast %255 : vector<16xf32> to vector<16x1xf32>
    %257 = vector.broadcast %256 : vector<16x1xf32> to vector<16x16xf32>
    %258 = arith.subf %254, %257 : vector<16x16xf32>
    %259 = math.exp %258 : vector<16x16xf32>
    %cst_121 = arith.constant dense<0.000000e+00> : vector<16xf32>
    %260 = vector.multi_reduction <add>, %259, %cst_121 [1] : vector<16x16xf32> to vector<16xf32>
    %261 = vector.shape_cast %260 : vector<16xf32> to vector<16x1xf32>
    %262 = tpu.reciprocal %261 {approx = true} : vector<16x1xf32> -> vector<16x1xf32>
    %263 = vector.broadcast %262 : vector<16x1xf32> to vector<16x16xf32>
    %264 = arith.mulf %259, %263 : vector<16x16xf32>
    %265 = vector.broadcast %250 : vector<1x32xf32> to vector<16x32xf32>
    %266 = arith.mulf %207, %265 : vector<16x32xf32>
    %cst_122 = arith.constant dense<0.000000e+00> : vector<16x32xf32>
    %267 = tpu.matmul %264, %266, %cst_122 {dimension_numbers = #tpu.dot_dimension_numbers<[1], [0], [0], [1], [0, 0, 1, 1], [], []>} : vector<16x16xf32>, vector<16x32xf32>, vector<16x32xf32> -> vector<16x32xf32>
    %268 = arith.addf %248, %267 : vector<16x32xf32>
    %c3_123 = arith.constant 3 : index
    %c0_124 = arith.constant 0 : index
    %c0_125 = arith.constant 0 : index
    %269 = vector.load %arg5[%c3_123, %c0_124, %c0_125] : memref<4x1x32xf32, #tpu.memory_space<vmem>>, vector<1x1x32xf32>
    %270 = vector.shape_cast %269 : vector<1x1x32xf32> to vector<1x32xf32>
    %271 = vector.broadcast %270 : vector<1x32xf32> to vector<16x32xf32>
    %272 = arith.mulf %205, %271 : vector<16x32xf32>
    %cst_126 = arith.constant dense<0.000000e+00> : vector<16x16xf32>
    %273 = tpu.matmul %272, %206, %cst_126 {dimension_numbers = #tpu.dot_dimension_numbers<[1], [1], [0], [0], [0, 0, 1, 0], [], []>} : vector<16x32xf32>, vector<16x32xf32>, vector<16x16xf32> -> vector<16x16xf32>
    %274 = arith.addf %273, %29 : vector<16x16xf32>
    %cst_127 = arith.constant dense<0xFF800000> : vector<16xf32>
    %275 = vector.multi_reduction <maximumf>, %274, %cst_127 [1] : vector<16x16xf32> to vector<16xf32>
    %276 = vector.shape_cast %275 : vector<16xf32> to vector<16x1xf32>
    %277 = vector.broadcast %276 : vector<16x1xf32> to vector<16x16xf32>
    %278 = arith.subf %274, %277 : vector<16x16xf32>
    %279 = math.exp %278 : vector<16x16xf32>
    %cst_128 = arith.constant dense<0.000000e+00> : vector<16xf32>
    %280 = vector.multi_reduction <add>, %279, %cst_128 [1] : vector<16x16xf32> to vector<16xf32>
    %281 = vector.shape_cast %280 : vector<16xf32> to vector<16x1xf32>
    %282 = tpu.reciprocal %281 {approx = true} : vector<16x1xf32> -> vector<16x1xf32>
    %283 = vector.broadcast %282 : vector<16x1xf32> to vector<16x16xf32>
    %284 = arith.mulf %279, %283 : vector<16x16xf32>
    %285 = vector.broadcast %270 : vector<1x32xf32> to vector<16x32xf32>
    %286 = arith.mulf %207, %285 : vector<16x32xf32>
    %cst_129 = arith.constant dense<0.000000e+00> : vector<16x32xf32>
    %287 = tpu.matmul %284, %286, %cst_129 {dimension_numbers = #tpu.dot_dimension_numbers<[1], [0], [0], [1], [0, 0, 1, 1], [], []>} : vector<16x16xf32>, vector<16x32xf32>, vector<16x32xf32> -> vector<16x32xf32>
    %288 = arith.addf %268, %287 : vector<16x32xf32>
    %c1_130 = arith.constant 1 : index
    %c0_131 = arith.constant 0 : index
    %c0_132 = arith.constant 0 : index
    %289 = vector.load %arg10[%c1_130, %c0_131, %c0_132] : memref<2x32x32xf32, #tpu.memory_space<vmem>>, vector<1x32x32xf32>
    %290 = vector.shape_cast %289 : vector<1x32x32xf32> to vector<32x32xf32>
    %cst_133 = arith.constant dense<0.000000e+00> : vector<16x32xf32>
    %291 = tpu.matmul %288, %290, %cst_133 {dimension_numbers = #tpu.dot_dimension_numbers<[1], [0], [0], [1], [0, 0, 1, 1], [], []>} : vector<16x32xf32>, vector<32x32xf32>, vector<16x32xf32> -> vector<16x32xf32>
    %c1_134 = arith.constant 1 : index
    %c0_135 = arith.constant 0 : index
    %c0_136 = arith.constant 0 : index
    %292 = vector.load %arg11[%c1_134, %c0_135, %c0_136] : memref<2x1x32xf32, #tpu.memory_space<vmem>>, vector<1x1x32xf32>
    %293 = vector.shape_cast %292 : vector<1x1x32xf32> to vector<1x32xf32>
    %294 = vector.broadcast %293 : vector<1x32xf32> to vector<16x32xf32>
    %295 = arith.addf %291, %294 : vector<16x32xf32>
    %296 = arith.addf %195, %295 : vector<16x32xf32>
    %c1_137 = arith.constant 1 : index
    %c0_138 = arith.constant 0 : index
    %c0_139 = arith.constant 0 : index
    %297 = vector.load %arg12[%c1_137, %c0_138, %c0_139] : memref<2x1x32xf32, #tpu.memory_space<vmem>>, vector<1x1x32xf32>
    %298 = vector.shape_cast %297 : vector<1x1x32xf32> to vector<1x32xf32>
    %c1_140 = arith.constant 1 : index
    %c0_141 = arith.constant 0 : index
    %c0_142 = arith.constant 0 : index
    %299 = vector.load %arg13[%c1_140, %c0_141, %c0_142] : memref<2x1x32xf32, #tpu.memory_space<vmem>>, vector<1x1x32xf32>
    %300 = vector.shape_cast %299 : vector<1x1x32xf32> to vector<1x32xf32>
    %cst_143 = arith.constant dense<0.000000e+00> : vector<16xf32>
    %301 = vector.multi_reduction <add>, %296, %cst_143 [1] : vector<16x32xf32> to vector<16xf32>
    %302 = vector.shape_cast %301 : vector<16xf32> to vector<16x1xf32>
    %cst_144 = arith.constant 3.200000e+01 : f32
    %303 = vector.broadcast %cst_144 : f32 to vector<16x1xf32>
    %304 = arith.divf %302, %303 : vector<16x1xf32>
    %305 = vector.broadcast %304 : vector<16x1xf32> to vector<16x32xf32>
    %306 = arith.subf %296, %305 : vector<16x32xf32>
    %307 = arith.mulf %306, %306 : vector<16x32xf32>
    %cst_145 = arith.constant dense<0.000000e+00> : vector<16xf32>
    %308 = vector.multi_reduction <add>, %307, %cst_145 [1] : vector<16x32xf32> to vector<16xf32>
    %309 = vector.shape_cast %308 : vector<16xf32> to vector<16x1xf32>
    %cst_146 = arith.constant 3.200000e+01 : f32
    %310 = vector.broadcast %cst_146 : f32 to vector<16x1xf32>
    %311 = arith.divf %309, %310 : vector<16x1xf32>
    %cst_147 = arith.constant 9.99999974E-6 : f32
    %312 = vector.broadcast %cst_147 : f32 to vector<16x1xf32>
    %313 = arith.addf %311, %312 : vector<16x1xf32>
    %314 = math.rsqrt %313 : vector<16x1xf32>
    %315 = vector.broadcast %314 : vector<16x1xf32> to vector<16x32xf32>
    %316 = arith.mulf %306, %315 : vector<16x32xf32>
    %317 = vector.broadcast %298 : vector<1x32xf32> to vector<16x32xf32>
    %318 = arith.mulf %316, %317 : vector<16x32xf32>
    %319 = vector.broadcast %300 : vector<1x32xf32> to vector<16x32xf32>
    %320 = arith.addf %318, %319 : vector<16x32xf32>
    %c1_148 = arith.constant 1 : index
    %c0_149 = arith.constant 0 : index
    %c0_150 = arith.constant 0 : index
    %321 = vector.load %arg14[%c1_148, %c0_149, %c0_150] : memref<2x32x128xf32, #tpu.memory_space<vmem>>, vector<1x32x128xf32>
    %322 = vector.shape_cast %321 : vector<1x32x128xf32> to vector<32x128xf32>
    %cst_151 = arith.constant dense<0.000000e+00> : vector<16x128xf32>
    %323 = tpu.matmul %320, %322, %cst_151 {dimension_numbers = #tpu.dot_dimension_numbers<[1], [0], [0], [1], [0, 0, 1, 1], [], []>} : vector<16x32xf32>, vector<32x128xf32>, vector<16x128xf32> -> vector<16x128xf32>
    %c1_152 = arith.constant 1 : index
    %c0_153 = arith.constant 0 : index
    %c0_154 = arith.constant 0 : index
    %324 = vector.load %arg15[%c1_152, %c0_153, %c0_154] : memref<2x1x128xf32, #tpu.memory_space<vmem>>, vector<1x1x128xf32>
    %325 = vector.shape_cast %324 : vector<1x1x128xf32> to vector<1x128xf32>
    %326 = vector.broadcast %325 : vector<1x128xf32> to vector<16x128xf32>
    %327 = arith.addf %323, %326 : vector<16x128xf32>
    %cst_155 = arith.constant 0.000000e+00 : f32
    %328 = vector.broadcast %cst_155 : f32 to vector<16x128xf32>
    %329 = arith.maximumf %327, %328 : vector<16x128xf32>
    %c1_156 = arith.constant 1 : index
    %c0_157 = arith.constant 0 : index
    %c0_158 = arith.constant 0 : index
    %330 = vector.load %arg16[%c1_156, %c0_157, %c0_158] : memref<2x128x32xf32, #tpu.memory_space<vmem>>, vector<1x128x32xf32>
    %331 = vector.shape_cast %330 : vector<1x128x32xf32> to vector<128x32xf32>
    %cst_159 = arith.constant dense<0.000000e+00> : vector<16x32xf32>
    %332 = tpu.matmul %329, %331, %cst_159 {dimension_numbers = #tpu.dot_dimension_numbers<[1], [0], [0], [1], [0, 0, 1, 1], [], []>} : vector<16x128xf32>, vector<128x32xf32>, vector<16x32xf32> -> vector<16x32xf32>
    %c1_160 = arith.constant 1 : index
    %c0_161 = arith.constant 0 : index
    %c0_162 = arith.constant 0 : index
    %333 = vector.load %arg17[%c1_160, %c0_161, %c0_162] : memref<2x1x32xf32, #tpu.memory_space<vmem>>, vector<1x1x32xf32>
    %334 = vector.shape_cast %333 : vector<1x1x32xf32> to vector<1x32xf32>
    %335 = vector.broadcast %334 : vector<1x32xf32> to vector<16x32xf32>
    %336 = arith.addf %332, %335 : vector<16x32xf32>
    %337 = arith.addf %320, %336 : vector<16x32xf32>
    %c1_163 = arith.constant 1 : index
    %c0_164 = arith.constant 0 : index
    %c0_165 = arith.constant 0 : index
    %338 = vector.load %arg18[%c1_163, %c0_164, %c0_165] : memref<2x1x32xf32, #tpu.memory_space<vmem>>, vector<1x1x32xf32>
    %339 = vector.shape_cast %338 : vector<1x1x32xf32> to vector<1x32xf32>
    %c1_166 = arith.constant 1 : index
    %c0_167 = arith.constant 0 : index
    %c0_168 = arith.constant 0 : index
    %340 = vector.load %arg19[%c1_166, %c0_167, %c0_168] : memref<2x1x32xf32, #tpu.memory_space<vmem>>, vector<1x1x32xf32>
    %341 = vector.shape_cast %340 : vector<1x1x32xf32> to vector<1x32xf32>
    %cst_169 = arith.constant dense<0.000000e+00> : vector<16xf32>
    %342 = vector.multi_reduction <add>, %337, %cst_169 [1] : vector<16x32xf32> to vector<16xf32>
    %343 = vector.shape_cast %342 : vector<16xf32> to vector<16x1xf32>
    %cst_170 = arith.constant 3.200000e+01 : f32
    %344 = vector.broadcast %cst_170 : f32 to vector<16x1xf32>
    %345 = arith.divf %343, %344 : vector<16x1xf32>
    %346 = vector.broadcast %345 : vector<16x1xf32> to vector<16x32xf32>
    %347 = arith.subf %337, %346 : vector<16x32xf32>
    %348 = arith.mulf %347, %347 : vector<16x32xf32>
    %cst_171 = arith.constant dense<0.000000e+00> : vector<16xf32>
    %349 = vector.multi_reduction <add>, %348, %cst_171 [1] : vector<16x32xf32> to vector<16xf32>
    %350 = vector.shape_cast %349 : vector<16xf32> to vector<16x1xf32>
    %cst_172 = arith.constant 3.200000e+01 : f32
    %351 = vector.broadcast %cst_172 : f32 to vector<16x1xf32>
    %352 = arith.divf %350, %351 : vector<16x1xf32>
    %cst_173 = arith.constant 9.99999974E-6 : f32
    %353 = vector.broadcast %cst_173 : f32 to vector<16x1xf32>
    %354 = arith.addf %352, %353 : vector<16x1xf32>
    %355 = math.rsqrt %354 : vector<16x1xf32>
    %356 = vector.broadcast %355 : vector<16x1xf32> to vector<16x32xf32>
    %357 = arith.mulf %347, %356 : vector<16x32xf32>
    %358 = vector.broadcast %339 : vector<1x32xf32> to vector<16x32xf32>
    %359 = arith.mulf %357, %358 : vector<16x32xf32>
    %360 = vector.broadcast %341 : vector<1x32xf32> to vector<16x32xf32>
    %361 = arith.addf %359, %360 : vector<16x32xf32>
    %c0_174 = arith.constant 0 : index
    %c0_175 = arith.constant 0 : index
    %362 = vector.load %arg20[%c0_174, %c0_175] : memref<32x128xf32, #tpu.memory_space<vmem>>, vector<32x128xf32>
    %cst_176 = arith.constant dense<0.000000e+00> : vector<16x128xf32>
    %363 = tpu.matmul %361, %362, %cst_176 {dimension_numbers = #tpu.dot_dimension_numbers<[1], [0], [0], [1], [0, 0, 1, 1], [], []>} : vector<16x32xf32>, vector<32x128xf32>, vector<16x128xf32> -> vector<16x128xf32>
    %c0_177 = arith.constant 0 : index
    %c0_178 = arith.constant 0 : index
    %364 = vector.load %arg21[%c0_177, %c0_178] : memref<1x128xf32, #tpu.memory_space<vmem>>, vector<1x128xf32>
    %365 = vector.broadcast %364 : vector<1x128xf32> to vector<16x128xf32>
    %366 = arith.addf %363, %365 : vector<16x128xf32>
    %c0_179 = arith.constant 0 : index
    %c0_180 = arith.constant 0 : index
    %367 = vector.load %arg22[%c0_179, %c0_180] : memref<16x128xf32, #tpu.memory_space<vmem>>, vector<16x128xf32>
    tpu.vector_store %arg22[%c0_179, %c0_180], %366 {strides = array<i32>} : memref<16x128xf32, #tpu.memory_space<vmem>>, vector<16x128xf32>,
    return
  }
  func.func @transform_0(%arg0: i32) -> (i32, i32) {
    %c0_i32 = arith.constant 0 : i32
    %c0_i32_0 = arith.constant 0 : i32
    %c0_i32_1 = arith.constant 0 : i32
    return %c0_i32, %c0_i32_0 : i32, i32
  }
  func.func @transform_1(%arg0: i32) -> (i32, i32) {
    %c0_i32 = arith.constant 0 : i32
    %c0_i32_0 = arith.constant 0 : i32
    %c0_i32_1 = arith.constant 0 : i32
    return %c0_i32, %c0_i32_0 : i32, i32
  }
  func.func @transform_2(%arg0: i32) -> (i32, i32) {
    %c0_i32 = arith.constant 0 : i32
    %c0_i32_0 = arith.constant 0 : i32
    %c0_i32_1 = arith.constant 0 : i32
    return %c0_i32, %c0_i32_0 : i32, i32
  }
  func.func @transform_3(%arg0: i32) -> (i32, i32) {
    %c0_i32 = arith.constant 0 : i32
    %c0_i32_0 = arith.constant 0 : i32
    %c0_i32_1 = arith.constant 0 : i32
    return %c0_i32, %c0_i32_0 : i32, i32
  }
  func.func @transform_4(%arg0: i32) -> (i32, i32, i32) {
    %c0_i32 = arith.constant 0 : i32
    %c0_i32_0 = arith.constant 0 : i32
    %c0_i32_1 = arith.constant 0 : i32
    %c0_i32_2 = arith.constant 0 : i32
    return %c0_i32, %c0_i32_0, %c0_i32_1 : i32, i32, i32
  }
  func.func @transform_5(%arg0: i32) -> (i32, i32) {
    %c0_i32 = arith.constant 0 : i32
    %c0_i32_0 = arith.constant 0 : i32
    %c0_i32_1 = arith.constant 0 : i32
    return %c0_i32, %c0_i32_0 : i32, i32
  }
  func.func @transform_6(%arg0: i32) -> (i32, i32) {
    %c0_i32 = arith.constant 0 : i32
    %c0_i32_0 = arith.constant 0 : i32
    %c0_i32_1 = arith.constant 0 : i32
    return %c0_i32, %c0_i32_0 : i32, i32
  }
  func.func @transform_7(%arg0: i32) -> (i32, i32, i32) {
    %c0_i32 = arith.constant 0 : i32
    %c0_i32_0 = arith.constant 0 : i32
    %c0_i32_1 = arith.constant 0 : i32
    %c0_i32_2 = arith.constant 0 : i32
    return %c0_i32, %c0_i32_0, %c0_i32_1 : i32, i32, i32
  }
  func.func @transform_8(%arg0: i32) -> (i32, i32, i32) {
    %c0_i32 = arith.constant 0 : i32
    %c0_i32_0 = arith.constant 0 : i32
    %c0_i32_1 = arith.constant 0 : i32
    %c0_i32_2 = arith.constant 0 : i32
    return %c0_i32, %c0_i32_0, %c0_i32_1 : i32, i32, i32
  }
  func.func @transform_9(%arg0: i32) -> (i32, i32, i32) {
    %c0_i32 = arith.constant 0 : i32
    %c0_i32_0 = arith.constant 0 : i32
    %c0_i32_1 = arith.constant 0 : i32
    %c0_i32_2 = arith.constant 0 : i32
    return %c0_i32, %c0_i32_0, %c0_i32_1 : i32, i32, i32
  }
  func.func @transform_10(%arg0: i32) -> (i32, i32, i32) {
    %c0_i32 = arith.constant 0 : i32
    %c0_i32_0 = arith.constant 0 : i32
    %c0_i32_1 = arith.constant 0 : i32
    %c0_i32_2 = arith.constant 0 : i32
    return %c0_i32, %c0_i32_0, %c0_i32_1 : i32, i32, i32
  }
  func.func @transform_11(%arg0: i32) -> (i32, i32, i32) {
    %c0_i32 = arith.constant 0 : i32
    %c0_i32_0 = arith.constant 0 : i32
    %c0_i32_1 = arith.constant 0 : i32
    %c0_i32_2 = arith.constant 0 : i32
    return %c0_i32, %c0_i32_0, %c0_i32_1 : i32, i32, i32
  }
  func.func @transform_12(%arg0: i32) -> (i32, i32, i32) {
    %c0_i32 = arith.constant 0 : i32
    %c0_i32_0 = arith.constant 0 : i32
    %c0_i32_1 = arith.constant 0 : i32
    %c0_i32_2 = arith.constant 0 : i32
    return %c0_i32, %c0_i32_0, %c0_i32_1 : i32, i32, i32
  }
  func.func @transform_13(%arg0: i32) -> (i32, i32, i32) {
    %c0_i32 = arith.constant 0 : i32
    %c0_i32_0 = arith.constant 0 : i32
    %c0_i32_1 = arith.constant 0 : i32
    %c0_i32_2 = arith.constant 0 : i32
    return %c0_i32, %c0_i32_0, %c0_i32_1 : i32, i32, i32
  }
  func.func @transform_14(%arg0: i32) -> (i32, i32, i32) {
    %c0_i32 = arith.constant 0 : i32
    %c0_i32_0 = arith.constant 0 : i32
    %c0_i32_1 = arith.constant 0 : i32
    %c0_i32_2 = arith.constant 0 : i32
    return %c0_i32, %c0_i32_0, %c0_i32_1 : i32, i32, i32
  }
  func.func @transform_15(%arg0: i32) -> (i32, i32, i32) {
    %c0_i32 = arith.constant 0 : i32
    %c0_i32_0 = arith.constant 0 : i32
    %c0_i32_1 = arith.constant 0 : i32
    %c0_i32_2 = arith.constant 0 : i32
    return %c0_i32, %c0_i32_0, %c0_i32_1 : i32, i32, i32
  }
  func.func @transform_16(%arg0: i32) -> (i32, i32, i32) {
    %c0_i32 = arith.constant 0 : i32
    %c0_i32_0 = arith.constant 0 : i32
    %c0_i32_1 = arith.constant 0 : i32
    %c0_i32_2 = arith.constant 0 : i32
    return %c0_i32, %c0_i32_0, %c0_i32_1 : i32, i32, i32
  }
  func.func @transform_17(%arg0: i32) -> (i32, i32, i32) {
    %c0_i32 = arith.constant 0 : i32
    %c0_i32_0 = arith.constant 0 : i32
    %c0_i32_1 = arith.constant 0 : i32
    %c0_i32_2 = arith.constant 0 : i32
    return %c0_i32, %c0_i32_0, %c0_i32_1 : i32, i32, i32
  }
  func.func @transform_18(%arg0: i32) -> (i32, i32, i32) {
    %c0_i32 = arith.constant 0 : i32
    %c0_i32_0 = arith.constant 0 : i32
    %c0_i32_1 = arith.constant 0 : i32
    %c0_i32_2 = arith.constant 0 : i32
    return %c0_i32, %c0_i32_0, %c0_i32_1 : i32, i32, i32
  }
  func.func @transform_19(%arg0: i32) -> (i32, i32) {
    %c0_i32 = arith.constant 0 : i32
    %c0_i32_0 = arith.constant 0 : i32
    %c0_i32_1 = arith.constant 0 : i32
    return %c0_i32, %c0_i32_0 : i32, i32
  }
  func.func @transform_20(%arg0: i32) -> (i32, i32) {
    %c0_i32 = arith.constant 0 : i32
    %c0_i32_0 = arith.constant 0 : i32
    %c0_i32_1 = arith.constant 0 : i32
    return %c0_i32, %c0_i32_0 : i32, i32
  }
  func.func @transform_21(%arg0: i32) -> (i32, i32) {
    %c0_i32 = arith.constant 0 : i32
    %c0_i32_0 = arith.constant 0 : i32
    %c0_i32_1 = arith.constant 0 : i32
    return %c0_i32, %c0_i32_0 : i32, i32
  }
}

</mosaic_0001>

<bundles_post_ra>
// kernel: native_decoder_forward.1
= control target key start
LH: loop header
LB: loop body
LE: loop exit
PB: predicated region body
PF: predicated region fallthrough
CT: control target
= control target key end

     0   :  { %vm79_vm0 = vcmask 130048   ;;  %v161_v11 = vlaneseq  ;;  %vm211_vm3 = vcmask 261120   ;;  %s4527_s5 = inlined_call_operand.vmem [shape: f32[16,32], index: 5, kind: input, shape index: {}]   ;;  %s4528_s0 = inlined_call_operand.vmem [shape: f32[16,16], index: 0, kind: input, shape index: {}]   ;;  %s4529_s7 = inlined_call_operand.vmem [shape: f32[2,32,96], index: 7, kind: input, shape index: {}]   ;;  %s4530_s6 = inlined_call_operand.vmem [shape: f32[1,32], index: 6, kind: input, shape index: {}]   ;;  %s4531_s1 = inlined_call_operand.vmem [shape: f32[16,32], index: 1, kind: input, shape index: {}]   ;;  %s4532_s2 = inlined_call_operand.vmem [shape: f32[16,32], index: 2, kind: input, shape index: {}]   ;;  %s4533_s8 = inlined_call_operand.vmem [shape: f32[2,1,96], index: 8, kind: input, shape index: {}]   ;;  %s4534_s4 = inlined_call_operand.vmem [shape: f32[4,1,32], index: 4, kind: input, shape index: {}]   ;;  %s4535_s3 = inlined_call_operand.vmem [shape: f32[16,16], index: 3, kind: input, shape index: {}]   ;;  %s4536_s9 = inlined_call_operand.vmem [shape: f32[2,32,32], index: 9, kind: input, shape index: {}]   ;;  %s4537_s10 = inlined_call_operand.vmem [shape: f32[2,1,32], index: 10, kind: input, shape index: {}]   ;;  %s4538_s13 = inlined_call_operand.vmem [shape: f32[2,32,128], index: 13, kind: input, shape index: {}]   ;;  %s4539_s15 = inlined_call_operand.vmem [shape: f32[2,128,32], index: 15, kind: input, shape index: {}]   ;;  %s4540_s11 = inlined_call_operand.vmem [shape: f32[2,1,32], index: 11, kind: input, shape index: {}]   ;;  %s4541_s12 = inlined_call_operand.vmem [shape: f32[2,1,32], index: 12, kind: input, shape index: {}]   ;;  %s4542_s14 = inlined_call_operand.vmem [shape: f32[2,1,128], index: 14, kind: input, shape index: {}]   ;;  %s4543_s16 = inlined_call_operand.vmem [shape: f32[2,1,32], index: 16, kind: input, shape index: {}]   ;;  %s4544_s17 = inlined_call_operand.vmem [shape: f32[2,1,32], index: 17, kind: input, shape index: {}]   ;;  %s4545_s18 = inlined_call_operand.vmem [shape: f32[2,1,32], index: 18, kind: input, shape index: {}]   ;;  %s4546_s19 = inlined_call_operand.vmem [shape: f32[32,128], index: 19, kind: input, shape index: {}]   ;;  %s4547_s20 = inlined_call_operand.vmem [shape: f32[1,128], index: 20, kind: input, shape index: {}]   ;;  %s4548_s21 = inlined_call_operand.vmem [shape: f32[16,128], index: 21, kind: output, shape index: {}]  }
   0x1   :  { %4554 = sst [smem:[#allocation2_spill]] %s4527_s5  ;;  %v2894_v29 = vld [vmem:[%s4533_s8] ss:$0 sm:$0xff]  ;;  %v3952_v35 = vld [vmem:[%s4534_s4 + $0x1] ss:$0 sm:$0xff]  ;;  %vm3968_vm4 = vmpackc.low %vm211_vm3, %vm211_vm3 }
   0x2   :  { %4555 = sst [smem:[#allocation3_spill]] %s4528_s0  ;;  %s4560_s26 = sld [smem:[#allocation2_spill]]  ;;  %v162_v12 = vshrl.u32 %v161_v11, 7  ;;  %v3947_v34 = vld [vmem:[%s4534_s4] ss:$0 sm:$0xff]  ;;  %v4015_v51 = vld [vmem:[%s4535_s3 + $0x8] sm:$0xff] }
   0x3   :  { %4556 = sst [smem:[#allocation4_spill]] %s4529_s7  ;;  %s4561_s29 = sld [smem:[#allocation3_spill]]  ;;  %v3995_v46 = vld [vmem:[%s4534_s4 + $0x2] ss:$0 sm:$0xff] }
   0x4   :  { %4557 = sst [smem:[#allocation5_spill]] %s4530_s6  ;;  %s4562_s23 = sld [smem:[#allocation4_spill]]  ;;  %v163_v13 = vadd.s32 8, %v162_v12  ;;  %v168_v15 = vand.u32 7, %v162_v12  ;;  %v4020_v52 = vld [vmem:[%s4535_s3] sm:$0xff] }
   0x5   :  { %4558 = sst [smem:[#allocation6_spill]] %s4531_s1  ;;  %s4563_s1 = sld [smem:[#allocation5_spill]] }
   0x6   :  { %4559 = sst [smem:[#allocation7_spill]] %s4532_s2  ;;  %v175_v14 = vand.u32 7, %v163_v13  ;;  %s4564_s30 = sld [smem:[#allocation6_spill]]  ;;  %vm188_vm2 = vcmp.eq.s32.totalorder %v168_v15, 0 }
   0x7   :  { %s4565_s7 = sld [smem:[#allocation7_spill]]  ;;  %s3777_s3 = smov 64  }
   0x8   :  { %v70_v0 = vld [vmem:[%s4560_s26] sm:$0xff]  ;;  %v71_v1 = vld [vmem:[%s4560_s26 + $0x8] sm:$0xff]  ;;  %vm189_vm1 = vcmp.eq.s32.totalorder %v175_v14, 0 }
   0x9   :  { %v68_v2 = vld [vmem:[%s4561_s29] sm:$0xff]  ;;  %v3428_v3 = vpack.c.bf16 %v71_v1, %v70_v0  ;;  %v69_v4 = vld [vmem:[%s4561_s29 + $0x8] sm:$0xff] }
   0xa   :  { %3166 = vmatprep.mubr.msk.f32.mxu0 %vm79_vm0, %v68_v2  ;;  %v200_v5 = vld [vmem:[%s4562_s23] sm:$0xff]  ;;  %v201_v6 = vld [vmem:[%s4562_s23 + $0x8] sm:$0xff]  ;;  %v202_v8 = vld [vmem:[%s4562_s23 + $0x10] sm:$0xff] }
   0xb   :  { %3429 = vmatprep.subr.bf16.mxu0 %v3428_v3  ;;  %v3432_v7 = vpack.c.bf16 %v201_v6, %v200_v5  ;;  %v203_v9 = vld [vmem:[%s4562_s23 + $0x18] sm:$0xff]  ;;  %v2891_v16 = vld [vmem:[%s4563_s1] ss:$0 sm:$0xff] }
   0xc   :  { %3431 = vmatpush3.bf16.msra.mxu0 %v3428_v3  ;;  %v3436_v10 = vpack.c.bf16 %v203_v9, %v202_v8  ;;  %v191_v18 = vld [vmem:[%s4564_s30 + $0x8] sm:$0xff]  ;;  %v190_v21 = vld [vmem:[%s4564_s30] sm:$0xff]  ;;  %s3776_s30 = smov 96  }
   0xd   :  { %3433 = vmatprep.subr.bf16.mxu0 %v3432_v7  ;;  %v194_v23 = vld [vmem:[%s4565_s7] sm:$0xff]  ;;  %v195_v25 = vld [vmem:[%s4565_s7 + $0x8] sm:$0xff] }
   0xf   :  { %3167 = vmatmul.mubr.msk.f32.vlgmr.msra.gmra.mrb[0].mxu0 %vm79_vm0, %v69_v4 }
  0x10   :  { %3435 = vmatpush3.bf16.msra.mxu0 %v3432_v7 }
  0x11   :  { %3437 = vmatprep.subr.bf16.mxu0 %v3436_v10 }
  0x14   :  { %3439 = vmatpush3.bf16.msra.mxu0 %v3436_v10 }
  0xe2   :  { %v3168_v17 = vpop.f32.mrb[0].mxu0 }
  0xe3   :  { %v158_v19 = vadd.f32 %v3168_v17, %v2891_v16  ;;  %v152_v20 = vpop.f32.mrb[1].mxu0 }
  0xe4   :  { %v153_v22 = vadd.f32 %v2891_v16, %v152_v20 }
  0xe5   :  { %v193_v24 = vsel %vm189_vm1, %v191_v18, %v158_v19 }
  0xe6   :  { %v192_v26 = vsel %vm188_vm2, %v190_v21, %v153_v22  ;;  %v3931_v28 = vadd.f32 %v195_v25, %v193_v24 }
  0xe7   :  { %v3929_v27 = vadd.f32 %v194_v23, %v192_v26 }
  0xe9   :  { %3177 = vmatprep.mubr.msk.f32.mxu0 %vm211_vm3, %v3929_v27 }
  0xea   :  { %3178 = vmatmul.mubr.msk.f32.vlgmr.msra.gmra.mrb[2].mxu0 %vm211_vm3, %v3931_v28 }
 0x1bd   :  { %v3179_v30 = vpop.f32.mrb[2].mxu0 }
 0x1be   :  { %v3940_v31 = vadd.f32 %v3179_v30, %v2894_v29  ;;  %v284_v32 = vpop.f32.mrb[3].mxu0 }
 0x1bf   :  { %v3942_v33 = vadd.f32 %v2894_v29, %v284_v32 }
 0x1c0   :  { %v3987_v45 = vmul.f32 0.35355338, %v3940_v31 }
 0x1c1   :  { %v3646_v36 = vpack.i.bf16 %v3940_v31, %v3942_v33  ;;  %v3957_v37 = vmul.f32 0.35355338, %v3942_v33 }
 0x1c2   :  { %v303_v47 = vmul.f32 %v3947_v34, %v3987_v45  ;;  %v431_v48 = vmul.f32 %v3952_v35, %v3987_v45  ;;  %v727_v50 = vmul.f32 %v3995_v46, %v3987_v45 }
 0x1c3   :  { %3647 = vrot.lane.b32.xlu0 %v3646_v36, %s3776_s30  ;;  %v302_v38 = vmul.f32 %v3947_v34, %v3957_v37  ;;  %v430_v39 = vmul.f32 %v3952_v35, %v3957_v37  ;;  %v726_v49 = vmul.f32 %v3995_v46, %v3957_v37 }
 0x1c5   :  { %3184 = vmatprep.mubr.msk.f32.mxu0 %vm211_vm3, %v302_v38  ;;  %3191 = vmatprep.mubr.msk.f32.mxu1 %vm211_vm3, %v430_v39 }
 0x235   :  { %v3648_v40 = vpop.permute.xlu0 %3647 }
 0x236   :  { %v3650_v41 = vunpack.i.h.bf16 %v3648_v40  ;;  %v3649_v42 = vunpack.i.l.bf16 %v3648_v40 }
 0x238   :  { %v3972_v44 = vpack.c.bf16 %v3650_v41, %v3649_v42 }
 0x23a   :  { %3442 = vmatprep.subr.msk.bf16.mxu0 %vm3968_vm4, %v3972_v44  ;;  %3448 = vmatprep.subr.msk.bf16.mxu1 %vm3968_vm4, %v3972_v44 }
 0x23b   :  { %3445 = vmatpush3.bf16.xpose.msk.msra.mxu0 %vm3968_vm4, %v3972_v44  ;;  %3451 = vmatpush3.bf16.xpose.msk.msra.mxu1 %vm3968_vm4, %v3972_v44 }
 0x23c   :  { %3462 = vmatprep.subr.msk.bf16.mxu1 %vm3968_vm4, %v3972_v44 }
 0x242   :  { %3185 = vmatmul.mubr.msk.f32.vlgmr.msra.gmra.mrb[4].mxu0 %vm211_vm3, %v303_v47  ;;  %3192 = vmatmul.mubr.msk.f32.vlgmr.msra.gmra.mrb[0].mxu1 %vm211_vm3, %v431_v48 }
 0x243   :  { %3465 = vmatpush3.bf16.xpose.msk.msra.mxu1 %vm3968_vm4, %v3972_v44  ;;  %3212 = vmatprep.mubr.msk.f32.mxu1 %vm211_vm3, %v726_v49 }
 0x24a   :  { %3213 = vmatmul.mubr.msk.f32.vlgmr.msra.gmra.mrb[2].mxu1 %vm211_vm3, %v727_v50 }
 0x315   :  { %v3186_v53 = vpop.f32.mrb[4].mxu0  ;;  %v3193_v54 = vpop.f32.mrb[0].mxu1 }
 0x316   :  { %v510_v55 = vadd.f32 %v3193_v54, %v4015_v51  ;;  %v386_v56 = vpop.f32.mrb[5].mxu0  ;;  %v504_v57 = vpop.f32.mrb[1].mxu1  ;;  %v392_v59 = vadd.f32 %v3186_v53, %v4015_v51 }
 0x317   :  { %v505_v58 = vadd.f32 %v504_v57, %v4020_v52  ;;  %v387_v1 = vadd.f32 %v386_v56, %v4020_v52 }
 0x318   :  { %v516_v60 = vsel %vm79_vm0, %v510_v55, -inf  ;;  %v398_v62 = vsel %vm79_vm0, %v392_v59, -inf }
 0x319   :  { %517 = vmax.xlane.f32.xlu1 %v516_v60  ;;  %v513_v61 = vsel %vm79_vm0, %v505_v58, -inf  ;;  %v395_v3 = vsel %vm79_vm0, %v387_v1, -inf }
 0x31a   :  { %514 = vmax.xlane.f32.xlu0 %v513_v61 }
 0x31d   :  { %v3214_v63 = vpop.f32.mrb[2].mxu1  ;;  %399 = vmax.xlane.f32.xlu1 %v398_v62 }
 0x31e   :  { %v800_v0 = vpop.f32.mrb[3].mxu1  ;;  %v806_v2 = vadd.f32 %v3214_v63, %v4015_v51 }
 0x31f   :  { %v801_v4 = vadd.f32 %v800_v0, %v4020_v52 }
 0x320   :  { %v812_v5 = vsel %vm79_vm0, %v806_v2, -inf }
 0x321   :  { %v809_v6 = vsel %vm79_vm0, %v801_v4, -inf }
 0x32e   :  { %535 = vrot.lane.b32.xlu1 %v3952_v35, %s3777_s3 }
 0x330   :  { %417 = vrot.lane.b32.xlu0 %v3947_v34, %s3777_s3 }
 0x352   :  { %396 = vmax.xlane.f32.xlu1 %v395_v3 }
 0x356   :  { %813 = vmax.xlane.f32.xlu1 %v812_v5 }
 0x35a   :  { %810 = vmax.xlane.f32.xlu1 %v809_v6 }
 0x36b   :  { %831 = vrot.lane.b32.xlu1 %v3995_v46, %s3777_s3 }
 0x3a6   :  { %v518_v7 = vpop.xlane.xlu1 %517 }
 0x3a7   :  { %v520_v8 = vsub.f32 %v510_v55, %v518_v7  ;;  %v515_v18 = vpop.xlane.xlu0 %514 }
 0x3a8   :  { %v519_v19 = vsub.f32 %v505_v58, %v515_v18 }
 0x3a9   :  { %v523_v9 = vmul.f32 1.442695, %v520_v8 }
 0x3aa   :  { %v400_v10 = vpop.xlane.xlu1 %399  ;;  %v521_v21 = vmul.f32 1.442695, %v519_v19 }
 0x3ab   :  { %3696 = vpow2.f32 %v523_v9  ;;  %v402_v17 = vsub.f32 %v392_v59, %v400_v10  ;;  %v4061_v55 = vpop.permute.xlu0 %417 }
 0x3ac   :  { %v420_v58 = vmul.f32 %v4061_v55, %v3942_v33  ;;  %v421_v59 = vmul.f32 %v4061_v55, %v3940_v31 }
 0x3ad   :  { %v405_v20 = vmul.f32 1.442695, %v402_v17 }
 0x3ae   :  { %v4040_v11 = vpop.permute.xlu1 %535  ;;  %v3656_v61 = vpack.i.bf16 %v421_v59, %v420_v58 }
 0x3af   :  { %v538_v12 = vmul.f32 %v4040_v11, %v3942_v33  ;;  %v539_v13 = vmul.f32 %v4040_v11, %v3940_v31  ;;  %3698 = vpow2.f32 %v405_v20 }
 0x3b0   :  { %3700 = vpow2.f32 %v521_v21 }
 0x3b1   :  { %v3651_v14 = vpack.i.bf16 %v539_v13, %v538_v12 }
 0x3b3   :  { %3652 = vrot.lane.b32.xlu1 %v3651_v14, %s3777_s3 }
 0x3b5   :  { %v3697_v15 = vpop.eup %3696 }
 0x3b6   :  { %v528_v16 = vsel %vm79_vm0, %v3697_v15, 0.0 }
 0x3b7   :  { %529 = vadd.xlane.f32.xlu0 %v528_v16 }
 0x3b9   :  { %v4048_v22 = vpop.eup %3698 }
 0x3ba   :  { %v410_v23 = vsel %vm79_vm0, %v4048_v22, 0.0  ;;  %v3701_v24 = vpop.eup %3700 }
 0x3bb   :  { %v525_v25 = vsel %vm79_vm0, %v3701_v24, 0.0 }
 0x3d7   :  { %411 = vadd.xlane.f32.xlu1 %v410_v23 }
 0x3db   :  { %526 = vadd.xlane.f32.xlu1 %v525_v25 }
 0x3df   :  { %v397_v26 = vpop.xlane.xlu1 %396 }
 0x3e0   :  { %v401_v29 = vsub.f32 %v387_v1, %v397_v26 }
 0x3e2   :  { %v403_v30 = vmul.f32 1.442695, %v401_v29 }
 0x3e3   :  { %v814_v32 = vpop.xlane.xlu1 %813 }
 0x3e4   :  { %3702 = vpow2.f32 %v403_v30  ;;  %v816_v36 = vsub.f32 %v806_v2, %v814_v32  ;;  %v4084_v32 = vld [vmem:[%s4534_s4 + $0x3] ss:$0 sm:$0xff] }
 0x3e6   :  { %v819_v38 = vmul.f32 1.442695, %v816_v36  ;;  %v935_v36 = vmul.f32 %v4084_v32, %v3957_v37 }
 0x3e7   :  { %v811_v39 = vpop.xlane.xlu1 %810 }
 0x3e8   :  { %3704 = vpow2.f32 %v819_v38  ;;  %v815_v40 = vsub.f32 %v801_v4, %v811_v39  ;;  %v936_v38 = vmul.f32 %v4084_v32, %v3987_v45 }
 0x3ea   :  { %v817_v41 = vmul.f32 1.442695, %v815_v40 }
 0x3eb   :  { %v4059_v54 = vpop.permute.xlu1 %831 }
 0x3ec   :  { %3706 = vpow2.f32 %v817_v41  ;;  %v834_v56 = vmul.f32 %v4059_v54, %v3942_v33  ;;  %v835_v57 = vmul.f32 %v4059_v54, %v3940_v31 }
 0x3ee   :  { %v3703_v42 = vpop.eup %3702  ;;  %v3661_v60 = vpack.i.bf16 %v835_v57, %v834_v56 }
 0x3ef   :  { %v407_v47 = vsel %vm79_vm0, %v3703_v42, 0.0 }
 0x3f0   :  { %408 = vadd.xlane.f32.xlu1 %v407_v47 }
 0x3f2   :  { %v4054_v48 = vpop.eup %3704 }
 0x3f3   :  { %v824_v49 = vsel %vm79_vm0, %v4054_v48, 0.0 }
 0x3f4   :  { %825 = vadd.xlane.f32.xlu0 %v824_v49 }
 0x3f6   :  { %v3707_v50 = vpop.eup %3706 }
 0x3f7   :  { %v821_v53 = vsel %vm79_vm0, %v3707_v50, 0.0 }
 0x3f8   :  { %822 = vadd.xlane.f32.xlu1 %v821_v53 }
 0x409   :  { %3662 = vrot.lane.b32.xlu1 %v3661_v60, %s3777_s3 }
 0x40a   :  { %3657 = vrot.lane.b32.xlu0 %v3656_v61, %s3777_s3 }
 0x425   :  { %v3653_v62 = vpop.permute.xlu1 %3652 }
 0x426   :  { %v3655_v63 = vunpack.i.h.bf16 %v3653_v62  ;;  %v3654_v0 = vunpack.i.l.bf16 %v3653_v62 }
 0x428   :  { %v3452_v1 = vpack.c.bf16 %v3655_v63, %v3654_v0  ;;  %v1136_v0 = vld [vmem:[%s4536_s9] sm:$0xff] }
 0x42a   :  { %3453 = vmatprep.subr.bf16.mxu0 %v3452_v1 }
 0x42b   :  { %3455 = vmatpush3.bf16.msra.mxu0 %v3452_v1  ;;  %v1137_v1 = vld [vmem:[%s4536_s9 + $0x8] sm:$0xff] }
 0x444   :  { %v530_v3 = vpop.xlane.xlu0 %529 }
 0x445   :  { %3708 = vrcp.f32 %v530_v3  ;;  %v3480_v3 = vpack.c.bf16 %v1137_v1, %v1136_v0  ;;  %v1376_v0 = vld [vmem:[%s4539_s15 + $0x38] sm:$0xff] }
 0x447   :  { %3481 = vmatprep.subr.bf16.mxu1 %v3480_v3 }
 0x448   :  { %3483 = vmatpush3.bf16.msra.mxu1 %v3480_v3  ;;  %v1378_v3 = vld [vmem:[%s4539_s15 + $0x48] sm:$0xff] }
 0x44f   :  { %v3709_v5 = vpop.eup %3708 }
 0x450   :  { %v534_v8 = vmul.f32 %v3709_v5, %v3697_v15 }
 0x464   :  { %v412_v2 = vpop.xlane.xlu1 %411 }
 0x468   :  { %v527_v4 = vpop.xlane.xlu1 %526 }
 0x469   :  { %3710 = vrcp.f32 %v527_v4 }
 0x473   :  { %v3711_v6 = vpop.eup %3710 }
 0x474   :  { %v533_v7 = vmul.f32 %v3711_v6, %v3701_v24 }
 0x476   :  { %3198 = vmatprep.mubr.msk.f32.mxu0 %vm79_vm0, %v533_v7 }
 0x477   :  { %3199 = vmatmul.mubr.msk.f32.vlgmr.msra.gmra.mrb[6].mxu0 %vm79_vm0, %v534_v8 }
 0x47d   :  { %v409_v9 = vpop.xlane.xlu1 %408 }
 0x47e   :  { %3712 = vrcp.f32 %v409_v9 }
 0x47f   :  { %3714 = vrcp.f32 %v412_v2  ;;  %v1138_v2 = vld [vmem:[%s4536_s9 + $0x10] sm:$0xff] }
 0x481   :  { %v826_v10 = vpop.xlane.xlu0 %825 }
 0x485   :  { %v3658_v12 = vpop.permute.xlu0 %3657  ;;  %v823_v13 = vpop.xlane.xlu1 %822 }
 0x486   :  { %v3660_v14 = vunpack.i.h.bf16 %v3658_v12  ;;  %v3659_v16 = vunpack.i.l.bf16 %v3658_v12  ;;  %3716 = vrcp.f32 %v823_v13 }
 0x487   :  { %3718 = vrcp.f32 %v826_v10 }
 0x488   :  { %v3713_v17 = vpop.eup %3712  ;;  %v3456_v18 = vpack.c.bf16 %v3660_v14, %v3659_v16 }
 0x489   :  { %v3715_v19 = vpop.eup %3714  ;;  %v3663_v20 = vpop.permute.xlu1 %3662  ;;  %v415_v21 = vmul.f32 %v3713_v17, %v3703_v42 }
 0x48a   :  { %v3665_v15 = vunpack.i.h.bf16 %v3663_v20  ;;  %v3664_v23 = vunpack.i.l.bf16 %v3663_v20  ;;  %3457 = vmatprep.subr.bf16.mxu0 %v3456_v18  ;;  %v416_v24 = vmul.f32 %v3715_v19, %v4048_v22 }
 0x48b   :  { %3459 = vmatpush3.bf16.msra.mxu0 %v3456_v18  ;;  %3205 = vmatprep.mubr.msk.f32.mxu0 %vm79_vm0, %v415_v21  ;;  %v2928_v18 = vld [vmem:[%s4537_s10] ss:$0 sm:$0xff] }
 0x48c   :  { %v3466_v25 = vpack.c.bf16 %v3665_v15, %v3664_v23 }
 0x48e   :  { %3206 = vmatmul.mubr.msk.f32.vlgmr.msra.gmra.mrb[6].mxu0 %vm79_vm0, %v416_v24  ;;  %3467 = vmatprep.subr.bf16.mxu0 %v3466_v25 }
 0x48f   :  { %3469 = vmatpush3.bf16.msra.mxu0 %v3466_v25 }
 0x490   :  { %v3717_v26 = vpop.eup %3716  ;;  %3472 = vmatprep.subr.msk.bf16.mxu0 %vm3968_vm4, %v3972_v44 }
 0x491   :  { %v3719_v29 = vpop.eup %3718  ;;  %v829_v30 = vmul.f32 %v3717_v26, %v3707_v50 }
 0x492   :  { %v830_v22 = vmul.f32 %v3719_v29, %v4054_v48 }
 0x493   :  { %3219 = vmatprep.mubr.msk.f32.mxu0 %vm79_vm0, %v829_v30 }
 0x496   :  { %3220 = vmatmul.mubr.msk.f32.vlgmr.msra.gmra.mrb[6].mxu0 %vm79_vm0, %v830_v22 }
 0x497   :  { %3226 = vmatprep.mubr.msk.f32.mxu0 %vm211_vm3, %v935_v36 }
 0x498   :  { %3475 = vmatpush3.bf16.xpose.msk.msra.mxu0 %vm3968_vm4, %v3972_v44 }
 0x49f   :  { %3227 = vmatmul.mubr.msk.f32.vlgmr.msra.gmra.mrb[8].mxu0 %vm211_vm3, %v936_v38 }
 0x572   :  { %v3228_v39 = vpop.f32.mrb[8].mxu0 }
 0x573   :  { %v1015_v40 = vadd.f32 %v3228_v39, %v4015_v51  ;;  %v1009_v41 = vpop.f32.mrb[9].mxu0 }
 0x574   :  { %v1010_v42 = vadd.f32 %v1009_v41, %v4020_v52 }
 0x575   :  { %v1021_v37 = vsel %vm79_vm0, %v1015_v40, -inf }
 0x576   :  { %1022 = vmax.xlane.f32.xlu0 %v1021_v37  ;;  %v1018_v47 = vsel %vm79_vm0, %v1010_v42, -inf  ;;  %v1276_v37 = vld [vmem:[%s4538_s13 + $0x8] sm:$0xff] }
 0x577   :  { %1019 = vmax.xlane.f32.xlu1 %v1018_v47 }
 0x58c   :  { %1040 = vrot.lane.b32.xlu0 %v4084_v32, %s3777_s3 }
 0x603   :  { %v1023_v44 = vpop.xlane.xlu0 %1022 }
 0x604   :  { %v1025_v48 = vsub.f32 %v1015_v40, %v1023_v44  ;;  %v1020_v45 = vpop.xlane.xlu1 %1019  ;;  %v1277_v44 = vld [vmem:[%s4538_s13 + $0x10] sm:$0xff] }
 0x605   :  { %v1024_v49 = vsub.f32 %v1010_v42, %v1020_v45  ;;  %v1275_v42 = vld [vmem:[%s4538_s13] sm:$0xff] }
 0x606   :  { %v1028_v50 = vmul.f32 1.442695, %v1025_v48  ;;  %v3488_v47 = vpack.c.bf16 %v1276_v37, %v1275_v42  ;;  %v1278_v48 = vld [vmem:[%s4538_s13 + $0x18] sm:$0xff]  ;;  %v2936_v42 = vld [vmem:[%s4543_s16] ss:$0 sm:$0xff] }
 0x607   :  { %v1026_v53 = vmul.f32 1.442695, %v1024_v49  ;;  %v4106_v60 = vpop.permute.xlu0 %1040  ;;  %v3492_v45 = vpack.c.bf16 %v1278_v48, %v1277_v44  ;;  %v1369_v49 = vld [vmem:[%s4539_s15] sm:$0xff] }
 0x608   :  { %3720 = vpow2.f32 %v1028_v50  ;;  %v1043_v61 = vmul.f32 %v4106_v60, %v3942_v33  ;;  %v1044_v62 = vmul.f32 %v4106_v60, %v3940_v31  ;;  %v1139_v31 = vld [vmem:[%s4536_s9 + $0x18] sm:$0xff]  ;;  %v1370_v50 = vld [vmem:[%s4539_s15 + $0x8] sm:$0xff] }
 0x609   :  { %3722 = vpow2.f32 %v1026_v53  ;;  %v3484_v33 = vpack.c.bf16 %v1139_v31, %v1138_v2  ;;  %v1371_v53 = vld [vmem:[%s4539_s15 + $0x10] sm:$0xff]  ;;  %v1377_v2 = vld [vmem:[%s4539_s15 + $0x40] sm:$0xff] }
 0x60a   :  { %v3666_v63 = vpack.i.bf16 %v1044_v62, %v1043_v61  ;;  %v1374_v61 = vld [vmem:[%s4539_s15 + $0x28] sm:$0xff]  ;;  %v3512_v31 = vpack.c.bf16 %v1378_v3, %v1377_v2  ;;  %v2939_v3 = vld [vmem:[%s4562_s23 + $0x20] sm:$0xff] }
 0x60b   :  { %3485 = vmatprep.subr.bf16.mxu1 %v3484_v33 }
 0x60c   :  { %3487 = vmatpush3.bf16.msra.mxu1 %v3484_v33  ;;  %v1379_v33 = vld [vmem:[%s4539_s15 + $0x50] sm:$0xff] }
 0x60d   :  { %3489 = vmatprep.subr.bf16.mxu1 %v3488_v47 }
 0x612   :  { %v3721_v56 = vpop.eup %3720 }
 0x613   :  { %v1033_v57 = vsel %vm79_vm0, %v3721_v56, 0.0  ;;  %v3723_v58 = vpop.eup %3722 }
 0x614   :  { %1034 = vadd.xlane.f32.xlu1 %v1033_v57  ;;  %v1030_v59 = vsel %vm79_vm0, %v3723_v58, 0.0  ;;  %v1372_v57 = vld [vmem:[%s4539_s15 + $0x18] sm:$0xff] }
 0x618   :  { %1031 = vadd.xlane.f32.xlu1 %v1030_v59  ;;  %v1373_v59 = vld [vmem:[%s4539_s15 + $0x20] sm:$0xff] }
 0x619   :  { %v3504_v62 = vpack.c.bf16 %v1374_v61, %v1373_v59 }
 0x629   :  { %3667 = vrot.lane.b32.xlu1 %v3666_v63, %s3777_s3  ;;  %v1375_v63 = vld [vmem:[%s4539_s15 + $0x30] sm:$0xff] }
 0x62a   :  { %v3508_v1 = vpack.c.bf16 %v1376_v0, %v1375_v63 }
 0x6a1   :  { %v1035_v4 = vpop.xlane.xlu1 %1034 }
 0x6a2   :  { %3724 = vrcp.f32 %v1035_v4  ;;  %v1380_v4 = vld [vmem:[%s4539_s15 + $0x58] sm:$0xff] }
 0x6a5   :  { %v1032_v5 = vpop.xlane.xlu1 %1031 }
 0x6a6   :  { %3726 = vrcp.f32 %v1032_v5  ;;  %v3516_v5 = vpack.c.bf16 %v1380_v4, %v1379_v33  ;;  %v2941_v4 = vld [vmem:[%s4562_s23 + $0x30] sm:$0xff] }
 0x6a9   :  { %v3668_v6 = vpop.permute.xlu1 %3667 }
 0x6aa   :  { %v3670_v7 = vunpack.i.h.bf16 %v3668_v6  ;;  %v3669_v8 = vunpack.i.l.bf16 %v3668_v6  ;;  %v1381_v6 = vld [vmem:[%s4539_s15 + $0x60] sm:$0xff] }
 0x6ac   :  { %v3476_v9 = vpack.c.bf16 %v3670_v7, %v3669_v8  ;;  %v3725_v10 = vpop.eup %3724  ;;  %v1382_v7 = vld [vmem:[%s4539_s15 + $0x68] sm:$0xff] }
 0x6ad   :  { %v1039_v14 = vmul.f32 %v3725_v10, %v3721_v56  ;;  %v3496_v56 = vpack.c.bf16 %v1370_v50, %v1369_v49  ;;  %v3520_v8 = vpack.c.bf16 %v1382_v7, %v1381_v6 }
 0x6ae   :  { %3477 = vmatprep.subr.bf16.mxu0 %v3476_v9 }
 0x6af   :  { %3479 = vmatpush3.bf16.msra.mxu0 %v3476_v9 }
 0x6b0   :  { %v3727_v12 = vpop.eup %3726  ;;  %3497 = vmatprep.subr.bf16.mxu0 %v3496_v56 }
 0x6b1   :  { %v1038_v13 = vmul.f32 %v3727_v12, %v3723_v58  ;;  %v3500_v58 = vpack.c.bf16 %v1372_v57, %v1371_v53 }
 0x6b3   :  { %3233 = vmatprep.mubr.msk.f32.mxu0 %vm79_vm0, %v1038_v13 }
 0x6b4   :  { %3234 = vmatmul.mubr.msk.f32.vlgmr.msra.gmra.mrb[6].mxu0 %vm79_vm0, %v1039_v14 }
 0x6b5   :  { %3499 = vmatpush3.bf16.msra.mxu0 %v3496_v56 }
 0x6b6   :  { %3501 = vmatprep.subr.bf16.mxu0 %v3500_v58 }
 0x6b9   :  { %3503 = vmatpush3.bf16.msra.mxu0 %v3500_v58 }
 0x6ba   :  { %3505 = vmatprep.subr.bf16.mxu0 %v3504_v62 }
 0x6bd   :  { %3507 = vmatpush3.bf16.msra.mxu0 %v3504_v62 }
 0x6be   :  { %3509 = vmatprep.subr.bf16.mxu0 %v3508_v1 }
 0x6c1   :  { %3511 = vmatpush3.bf16.msra.mxu0 %v3508_v1 }
 0x6c2   :  { %3513 = vmatprep.subr.bf16.mxu0 %v3512_v31 }
 0x6c5   :  { %3515 = vmatpush3.bf16.msra.mxu0 %v3512_v31  ;;  %v2940_v31 = vld [vmem:[%s4562_s23 + $0x28] sm:$0xff] }
 0x6c6   :  { %3517 = vmatprep.subr.bf16.mxu0 %v3516_v5  ;;  %v3528_v33 = vpack.c.bf16 %v2940_v31, %v2939_v3 }
 0x6c9   :  { %3519 = vmatpush3.bf16.msra.mxu0 %v3516_v5  ;;  %v2942_v5 = vld [vmem:[%s4562_s23 + $0x38] sm:$0xff] }
 0x6ca   :  { %3521 = vmatprep.subr.bf16.mxu0 %v3520_v8  ;;  %v3532_v6 = vpack.c.bf16 %v2942_v5, %v2941_v4 }
 0x6cd   :  { %3523 = vmatpush3.bf16.msra.mxu0 %v3520_v8 }
 0x787   :  { %v3235_v16 = vpop.f32.mrb[6].mxu0 }
 0x788   :  { %v1125_v17 = vpop.f32.mrb[7].mxu0 }
 0x789   :  { %3244 = vmatprep.mubr.msk.f32.mxu1 %vm211_vm3, %v1125_v17 }
 0x78a   :  { %3245 = vmatmul.mubr.msk.f32.vlgmr.msra.gmra.mrb[4].mxu1 %vm211_vm3, %v3235_v16 }
 0x78b   :  { %3491 = vmatpush3.bf16.msra.mxu1 %v3488_v47 }
 0x78c   :  { %3493 = vmatprep.subr.bf16.mxu1 %v3492_v45 }
 0x78f   :  { %3495 = vmatpush3.bf16.msra.mxu1 %v3492_v45 }
 0x790   :  { %3529 = vmatprep.subr.bf16.mxu1 %v3528_v33 }
 0x85d   :  { %v3246_v19 = vpop.f32.mrb[4].mxu1 }
 0x85e   :  { %v1225_v20 = vadd.f32 %v3246_v19, %v2928_v18  ;;  %v1219_v21 = vpop.f32.mrb[5].mxu1 }
 0x85f   :  { %v1220_v15 = vadd.f32 %v2928_v18, %v1219_v21  ;;  %v2931_v18 = vld [vmem:[%s4540_s11] ss:$0 sm:$0xff] }
 0x860   :  { %v1229_v23 = vadd.f32 %v1225_v20, %v3931_v28  ;;  %v2932_v20 = vld [vmem:[%s4541_s12] ss:$0 sm:$0xff] }
 0x861   :  { %v1228_v24 = vadd.f32 %v1220_v15, %v3929_v27 }
 0x862   :  { %v1235_v25 = vsel %vm211_vm3, %v1229_v23, 0.0 }
 0x863   :  { %1236 = vadd.xlane.f32.xlu1 %v1235_v25  ;;  %v1232_v26 = vsel %vm211_vm3, %v1228_v24, 0.0 }
 0x864   :  { %1233 = vadd.xlane.f32.xlu0 %v1232_v26 }
 0x8f0   :  { %v1237_v29 = vpop.xlane.xlu1 %1236 }
 0x8f1   :  { %v1240_v30 = vmul.f32 0.03125, %v1237_v29  ;;  %v1234_v22 = vpop.xlane.xlu0 %1233  ;;  %v1383_v29 = vld [vmem:[%s4539_s15 + $0x70] sm:$0xff] }
 0x8f2   :  { %v1239_v36 = vmul.f32 0.03125, %v1234_v22 }
 0x8f3   :  { %v4136_v38 = vsub.f32 %v1229_v23, %v1240_v30  ;;  %v1384_v30 = vld [vmem:[%s4539_s15 + $0x78] sm:$0xff] }
 0x8f4   :  { %v4138_v39 = vsub.f32 %v1228_v24, %v1239_v36  ;;  %v3524_v22 = vpack.c.bf16 %v1384_v30, %v1383_v29  ;;  %v2933_v36 = vld [vmem:[%s4542_s14] ss:$0 sm:$0xff] }
 0x8f5   :  { %v1244_v27 = vmul.f32 %v4136_v38, %v4136_v38 }
 0x8f6   :  { %v1243_v40 = vmul.f32 %v4138_v39, %v4138_v39  ;;  %3525 = vmatprep.subr.bf16.mxu0 %v3524_v22 }
 0x8f7   :  { %v1248_v41 = vsel %vm211_vm3, %v1244_v27, 0.0  ;;  %3527 = vmatpush3.bf16.msra.mxu0 %v3524_v22 }
 0x8f8   :  { %v1245_v28 = vsel %vm211_vm3, %v1243_v40, 0.0 }
 0x8f9   :  { %1246 = vadd.xlane.f32.xlu0 %v1245_v28 }
 0x8fd   :  { %1249 = vadd.xlane.f32.xlu0 %v1248_v41 }
 0x986   :  { %v1247_v9 = vpop.xlane.xlu0 %1246 }
 0x987   :  { %v1251_v10 = vmul.f32 0.03125, %v1247_v9 }
 0x989   :  { %v1253_v12 = vadd.f32 1e-05, %v1251_v10 }
 0x98a   :  { %v1250_v13 = vpop.xlane.xlu0 %1249 }
 0x98b   :  { %3728 = vrsqrt.f32 %v1253_v12  ;;  %v1252_v14 = vmul.f32 0.03125, %v1250_v13 }
 0x98d   :  { %v1254_v16 = vadd.f32 1e-05, %v1252_v14 }
 0x98f   :  { %3730 = vrsqrt.f32 %v1254_v16  ;;  %v2937_v16 = vld [vmem:[%s4544_s17] ss:$0 sm:$0xff] }
 0x995   :  { %v3729_v17 = vpop.eup %3728 }
 0x996   :  { %v1257_v19 = vmul.f32 %v3729_v17, %v4138_v39 }
 0x998   :  { %v1265_v21 = vmul.f32 %v2931_v18, %v1257_v19 }
 0x999   :  { %v3731_v15 = vpop.eup %3730 }
 0x99a   :  { %v1258_v23 = vmul.f32 %v3731_v15, %v4136_v38  ;;  %v1273_v24 = vadd.f32 %v2932_v20, %v1265_v21 }
 0x99c   :  { %v1266_v25 = vmul.f32 %v2931_v18, %v1258_v23  ;;  %3255 = vmatprep.mubr.msk.f32.mxu1 %vm211_vm3, %v1273_v24 }
 0x99e   :  { %v1274_v26 = vadd.f32 %v2932_v20, %v1266_v25  ;;  %v2938_v20 = vld [vmem:[%s4545_s18] ss:$0 sm:$0xff]  ;;  %v2944_v25 = vld [vmem:[%s4533_s8 + $0x1] ss:$0 sm:$0xff] }
 0x9a0   :  { %3256 = vmatmul.mubr.msk.f32.vlgmr.msra.gmra.mrb[6].mxu1 %vm211_vm3, %v1274_v26 }
 0x9a1   :  { %3531 = vmatpush3.bf16.msra.mxu1 %v3528_v33 }
 0x9a2   :  { %3533 = vmatprep.subr.bf16.mxu1 %v3532_v6 }
 0x9a5   :  { %3535 = vmatpush3.bf16.msra.mxu1 %v3532_v6 }
 0xa73   :  { %v3257_v38 = vpop.f32.mrb[6].mxu1 }
 0xa74   :  { %v1364_v39 = vadd.f32 %v3257_v38, %v2933_v36  ;;  %v1358_v40 = vpop.f32.mrb[7].mxu1 }
 0xa75   :  { %v1359_v28 = vadd.f32 %v2933_v36, %v1358_v40 }
 0xa76   :  { %v1368_v41 = vmax.f32 %v1364_v39, 0.0 }
 0xa77   :  { %v1367_v27 = vmax.f32 %v1359_v28, 0.0 }
 0xa79   :  { %3290 = vmatprep.mubr.f32.mxu0 %v1367_v27 }
 0xa7a   :  { %3291 = vmatmul.mubr.f32.vlgmr.msra.gmra.mrb[10].mxu0 %v1368_v41 }
 0xb4d   :  { %v3292_v37 = vpop.f32.mrb[10].mxu0 }
 0xb4e   :  { %v1464_v47 = vadd.f32 %v3292_v37, %v2936_v42  ;;  %v1458_v44 = vpop.f32.mrb[11].mxu0 }
 0xb4f   :  { %v1459_v48 = vadd.f32 %v2936_v42, %v1458_v44 }
 0xb50   :  { %v1468_v45 = vadd.f32 %v1464_v47, %v1274_v26 }
 0xb51   :  { %v1467_v49 = vadd.f32 %v1459_v48, %v1273_v24 }
 0xb52   :  { %v1474_v50 = vsel %vm211_vm3, %v1468_v45, 0.0 }
 0xb53   :  { %1475 = vadd.xlane.f32.xlu1 %v1474_v50  ;;  %v1471_v53 = vsel %vm211_vm3, %v1467_v49, 0.0 }
 0xb54   :  { %1472 = vadd.xlane.f32.xlu0 %v1471_v53 }
 0xbe0   :  { %v1476_v56 = vpop.xlane.xlu1 %1475 }
 0xbe1   :  { %v1478_v57 = vmul.f32 0.03125, %v1476_v56  ;;  %v1473_v58 = vpop.xlane.xlu0 %1472 }
 0xbe2   :  { %v1477_v59 = vmul.f32 0.03125, %v1473_v58 }
 0xbe3   :  { %v1480_v61 = vsub.f32 %v1468_v45, %v1478_v57 }
 0xbe4   :  { %v1479_v62 = vsub.f32 %v1467_v49, %v1477_v59 }
 0xbe5   :  { %v1482_v63 = vmul.f32 %v1480_v61, %v1480_v61 }
 0xbe6   :  { %v1481_v0 = vmul.f32 %v1479_v62, %v1479_v62 }
 0xbe7   :  { %v1486_v1 = vsel %vm211_vm3, %v1482_v63, 0.0 }
 0xbe8   :  { %1487 = vadd.xlane.f32.xlu1 %v1486_v1  ;;  %v1483_v2 = vsel %vm211_vm3, %v1481_v0, 0.0 }
 0xbe9   :  { %1484 = vadd.xlane.f32.xlu0 %v1483_v2 }
 0xc75   :  { %v1488_v7 = vpop.xlane.xlu1 %1487 }
 0xc76   :  { %v1490_v8 = vmul.f32 0.03125, %v1488_v7  ;;  %v1485_v9 = vpop.xlane.xlu0 %1484 }
 0xc77   :  { %v1489_v10 = vmul.f32 0.03125, %v1485_v9 }
 0xc78   :  { %v1492_v12 = vadd.f32 1e-05, %v1490_v8 }
 0xc79   :  { %v1491_v13 = vadd.f32 1e-05, %v1489_v10 }
 0xc7a   :  { %3732 = vrsqrt.f32 %v1492_v12 }
 0xc7b   :  { %3734 = vrsqrt.f32 %v1491_v13 }
 0xc84   :  { %v3733_v14 = vpop.eup %3732 }
 0xc85   :  { %v3735_v17 = vpop.eup %3734  ;;  %v1496_v18 = vmul.f32 %v3733_v14, %v1480_v61 }
 0xc86   :  { %v1495_v19 = vmul.f32 %v3735_v17, %v1479_v62 }
 0xc87   :  { %v1504_v21 = vmul.f32 %v2937_v16, %v1496_v18 }
 0xc88   :  { %v1503_v15 = vmul.f32 %v2937_v16, %v1495_v19 }
 0xc89   :  { %v4246_v24 = vadd.f32 %v2938_v20, %v1504_v21 }
 0xc8a   :  { %v4244_v23 = vadd.f32 %v2938_v20, %v1503_v15 }
 0xc8c   :  { %3301 = vmatprep.mubr.msk.f32.mxu1 %vm211_vm3, %v4244_v23 }
 0xc8d   :  { %3302 = vmatmul.mubr.msk.f32.vlgmr.msra.gmra.mrb[8].mxu1 %vm211_vm3, %v4246_v24 }
 0xd60   :  { %v3303_v26 = vpop.f32.mrb[8].mxu1 }
 0xd61   :  { %v1604_v29 = vadd.f32 %v3303_v26, %v2944_v25  ;;  %v1598_v30 = vpop.f32.mrb[9].mxu1 }
 0xd62   :  { %v1599_v22 = vadd.f32 %v2944_v25, %v1598_v30 }
 0xd63   :  { %v4256_v36 = vmul.f32 %v1604_v29, %v4040_v11  ;;  %v4259_v38 = vmul.f32 %v1604_v29, %v4059_v54  ;;  %v4268_v41 = vmul.f32 %v1604_v29, %v4061_v55  ;;  %v4286_v48 = vmul.f32 %v1604_v29, %v4106_v60 }
 0xd64   :  { %v3671_v39 = vpack.i.bf16 %v1604_v29, %v1599_v22  ;;  %v1607_v40 = vmul.f32 0.35355338, %v1599_v22  ;;  %v4262_v28 = vmul.f32 %v1599_v22, %v4040_v11  ;;  %v4265_v27 = vmul.f32 %v1599_v22, %v4059_v54 }
 0xd65   :  { %v4278_v11 = vmul.f32 %v1599_v22, %v4061_v55  ;;  %v4281_v54 = vmul.f32 %v1599_v22, %v4106_v60  ;;  %v1608_v60 = vmul.f32 0.35355338, %v1604_v29 }
 0xd66   :  { %3672 = vrot.lane.b32.xlu0 %v3671_v39, %s3776_s30  ;;  %v1609_v42 = vmul.f32 %v3947_v34, %v1607_v40  ;;  %v2011_v37 = vmul.f32 %v3995_v46, %v1607_v40  ;;  %v3676_v47 = vpack.i.bf16 %v4256_v36, %v4262_v28  ;;  %v3686_v44 = vpack.i.bf16 %v4259_v38, %v4265_v27 }
 0xd67   :  { %v3681_v45 = vpack.i.bf16 %v4268_v41, %v4278_v11  ;;  %v3691_v49 = vpack.i.bf16 %v4286_v48, %v4281_v54  ;;  %v1610_v57 = vmul.f32 %v3947_v34, %v1608_v60  ;;  %v2012_v58 = vmul.f32 %v3995_v46, %v1608_v60 }
 0xd68   :  { %3308 = vmatprep.mubr.msk.f32.mxu1 %vm211_vm3, %v1609_v42  ;;  %3336 = vmatprep.mubr.msk.f32.mxu0 %vm211_vm3, %v2011_v37  ;;  %v1726_v59 = vmul.f32 %v3952_v35, %v1607_v40  ;;  %v2209_v61 = vmul.f32 %v4084_v32, %v1607_v40  ;;  %v1727_v34 = vmul.f32 %v3952_v35, %v1608_v60 }
 0xd69   :  { %v2210_v46 = vmul.f32 %v4084_v32, %v1608_v60 }
 0xdd8   :  { %v3673_v50 = vpop.permute.xlu0 %3672 }
 0xdd9   :  { %v3675_v53 = vunpack.i.h.bf16 %v3673_v50  ;;  %v3674_v55 = vunpack.i.l.bf16 %v3673_v50 }
 0xddb   :  { %v3536_v56 = vpack.c.bf16 %v3675_v53, %v3674_v55 }
 0xddd   :  { %3538 = vmatprep.subr.msk.bf16.mxu1 %vm3968_vm4, %v3536_v56  ;;  %3558 = vmatprep.subr.msk.bf16.mxu0 %vm3968_vm4, %v3536_v56 }
 0xdde   :  { %3541 = vmatpush3.bf16.xpose.msk.msra.mxu1 %vm3968_vm4, %v3536_v56  ;;  %3561 = vmatpush3.bf16.xpose.msk.msra.mxu0 %vm3968_vm4, %v3536_v56 }
 0xddf   :  { %3544 = vmatprep.subr.msk.bf16.mxu1 %vm3968_vm4, %v3536_v56  ;;  %3568 = vmatprep.subr.msk.bf16.mxu0 %vm3968_vm4, %v3536_v56 }
 0xde5   :  { %3309 = vmatmul.mubr.msk.f32.vlgmr.msra.gmra.mrb[10].mxu1 %vm211_vm3, %v1610_v57  ;;  %3337 = vmatmul.mubr.msk.f32.vlgmr.msra.gmra.mrb[12].mxu0 %vm211_vm3, %v2012_v58 }
 0xde6   :  { %3547 = vmatpush3.bf16.xpose.msk.msra.mxu1 %vm3968_vm4, %v3536_v56  ;;  %3315 = vmatprep.mubr.msk.f32.mxu1 %vm211_vm3, %v1726_v59 }
 0xde7   :  { %3571 = vmatpush3.bf16.xpose.msk.msra.mxu0 %vm3968_vm4, %v3536_v56  ;;  %3350 = vmatprep.mubr.msk.f32.mxu0 %vm211_vm3, %v2209_v61 }
 0xded   :  { %3316 = vmatmul.mubr.msk.f32.vlgmr.msra.gmra.mrb[12].mxu1 %vm211_vm3, %v1727_v34 }
 0xdee   :  { %3351 = vmatmul.mubr.msk.f32.vlgmr.msra.gmra.mrb[14].mxu0 %vm211_vm3, %v2210_v46 }
 0xeb8   :  { %v3310_v62 = vpop.f32.mrb[10].mxu1  ;;  %v3338_v63 = vpop.f32.mrb[12].mxu0 }
 0xeb9   :  { %v1693_v0 = vpop.f32.mrb[11].mxu1  ;;  %v2085_v1 = vpop.f32.mrb[13].mxu0  ;;  %v1699_v8 = vadd.f32 %v3310_v62, %v4015_v51  ;;  %v2091_v13 = vadd.f32 %v3338_v63, %v4015_v51 }
 0xeba   :  { %v1694_v6 = vadd.f32 %v1693_v0, %v4020_v52  ;;  %v2086_v10 = vadd.f32 %v2085_v1, %v4020_v52 }
 0xebb   :  { %v1705_v12 = vsel %vm79_vm0, %v1699_v8, -inf  ;;  %v2097_v17 = vsel %vm79_vm0, %v2091_v13, -inf }
 0xebc   :  { %v1702_v9 = vsel %vm79_vm0, %v1694_v6, -inf  ;;  %v2094_v14 = vsel %vm79_vm0, %v2086_v10, -inf }
 0xec0   :  { %v3317_v2 = vpop.f32.mrb[12].mxu1 }
 0xec1   :  { %v1806_v3 = vadd.f32 %v3317_v2, %v4015_v51  ;;  %v3352_v31 = vpop.f32.mrb[14].mxu0  ;;  %v1800_v43 = vpop.f32.mrb[13].mxu1 }
 0xec2   :  { %v2283_v33 = vpop.f32.mrb[15].mxu0  ;;  %v4322_v4 = vadd.f32 %v1800_v43, %v4020_v52  ;;  %v2289_v16 = vadd.f32 %v3352_v31, %v4015_v51 }
 0xec3   :  { %v4325_v35 = vadd.f32 %v2283_v33, %v4020_v52  ;;  %v1812_v32 = vsel %vm79_vm0, %v1806_v3, -inf }
 0xec4   :  { %1813 = vmax.xlane.f32.xlu1 %v1812_v32  ;;  %v1809_v7 = vsel %vm79_vm0, %v4322_v4, -inf  ;;  %v2295_v18 = vsel %vm79_vm0, %v2289_v16, -inf }
 0xec5   :  { %v2292_v5 = vsel %vm79_vm0, %v4325_v35, -inf }
 0xec6   :  { %2293 = vmax.xlane.f32.xlu0 %v2292_v5 }
 0xec8   :  { %1810 = vmax.xlane.f32.xlu1 %v1809_v7 }
 0xecc   :  { %1703 = vmax.xlane.f32.xlu1 %v1702_v9 }
 0xed0   :  { %1706 = vmax.xlane.f32.xlu1 %v1705_v12 }
 0xed4   :  { %2095 = vmax.xlane.f32.xlu1 %v2094_v14 }
 0xed8   :  { %2098 = vmax.xlane.f32.xlu1 %v2097_v17 }
 0xedc   :  { %3677 = vrot.lane.b32.xlu0 %v3676_v47, %s3777_s3  ;;  %2296 = vmax.xlane.f32.xlu1 %v2295_v18 }
 0xee0   :  { %3687 = vrot.lane.b32.xlu0 %v3686_v44, %s3777_s3 }
 0xf51   :  { %v1814_v52 = vpop.xlane.xlu1 %1813 }
 0xf52   :  { %v1816_v47 = vsub.f32 %v1806_v3, %v1814_v52 }
 0xf53   :  { %v2294_v19 = vpop.xlane.xlu0 %2293 }
 0xf54   :  { %v1819_v55 = vmul.f32 1.442695, %v1816_v47  ;;  %v2298_v33 = vsub.f32 %v4325_v35, %v2294_v19  ;;  %v2974_v47 = vld [vmem:[%s4536_s9 + $0x38] sm:$0xff] }
 0xf55   :  { %v1811_v20 = vpop.xlane.xlu1 %1810 }
 0xf56   :  { %v1815_v57 = vsub.f32 %v4322_v4, %v1811_v20  ;;  %v2300_v4 = vmul.f32 1.442695, %v2298_v33 }
 0xf57   :  { %v3678_v51 = vpop.permute.xlu0 %3677 }
 0xf58   :  { %v3680_v21 = vunpack.i.h.bf16 %v3678_v51  ;;  %v3679_v15 = vunpack.i.l.bf16 %v3678_v51  ;;  %v1817_v34 = vmul.f32 1.442695, %v1815_v57  ;;  %v2976_v57 = vld [vmem:[%s4537_s10 + $0x1] ss:$0 sm:$0xff] }
 0xf59   :  { %v1704_v25 = vpop.xlane.xlu1 %1703 }
 0xf5a   :  { %v3548_v26 = vpack.c.bf16 %v3680_v21, %v3679_v15  ;;  %v1708_v39 = vsub.f32 %v1694_v6, %v1704_v25 }
 0xf5b   :  { %v3688_v14 = vpop.permute.xlu0 %3687 }
 0xf5c   :  { %3549 = vmatprep.subr.bf16.mxu1 %v3548_v26  ;;  %v1710_v38 = vmul.f32 1.442695, %v1708_v39  ;;  %v3689_v17 = vunpack.i.l.bf16 %v3688_v14  ;;  %v2972_v39 = vld [vmem:[%s4536_s9 + $0x28] sm:$0xff] }
 0xf5d   :  { %3551 = vmatpush3.bf16.msra.mxu1 %v3548_v26  ;;  %v1707_v29 = vpop.xlane.xlu1 %1706 }
 0xf5e   :  { %v1709_v30 = vsub.f32 %v1699_v8, %v1707_v29 }
 0xf60   :  { %v1712_v22 = vmul.f32 1.442695, %v1709_v30 }
 0xf61   :  { %v2096_v36 = vpop.xlane.xlu1 %2095 }
 0xf62   :  { %3736 = vpow2.f32 %v1712_v22  ;;  %v2100_v27 = vsub.f32 %v2086_v10, %v2096_v36  ;;  %v2971_v36 = vld [vmem:[%s4536_s9 + $0x20] sm:$0xff] }
 0xf64   :  { %v2102_v44 = vmul.f32 1.442695, %v2100_v27  ;;  %v3576_v27 = vpack.c.bf16 %v2972_v39, %v2971_v36 }
 0xf65   :  { %v2099_v40 = vpop.xlane.xlu1 %2098 }
 0xf66   :  { %v2101_v28 = vsub.f32 %v2091_v13, %v2099_v40 }
 0xf68   :  { %v2104_v42 = vmul.f32 1.442695, %v2101_v28 }
 0xf69   :  { %v2297_v50 = vpop.xlane.xlu1 %2296 }
 0xf6a   :  { %3738 = vpow2.f32 %v2104_v42  ;;  %v2299_v56 = vsub.f32 %v2289_v16, %v2297_v50 }
 0xf6b   :  { %3740 = vpow2.f32 %v1710_v38 }
 0xf6c   :  { %v4350_v37 = vpop.eup %3736  ;;  %3742 = vpow2.f32 %v2102_v44  ;;  %v2302_v58 = vmul.f32 1.442695, %v2299_v56 }
 0xf6d   :  { %v1717_v53 = vsel %vm79_vm0, %v4350_v37, 0.0  ;;  %3744 = vpow2.f32 %v1819_v55 }
 0xf6e   :  { %1718 = vadd.xlane.f32.xlu1 %v1717_v53  ;;  %3746 = vpow2.f32 %v2302_v58 }
 0xf6f   :  { %3748 = vpow2.f32 %v1817_v34 }
 0xf70   :  { %3750 = vpow2.f32 %v2300_v4 }
 0xf74   :  { %v4354_v60 = vpop.eup %3738 }
 0xf75   :  { %v2109_v59 = vsel %vm79_vm0, %v4354_v60, 0.0  ;;  %v3741_v61 = vpop.eup %3740 }
 0xf76   :  { %2110 = vadd.xlane.f32.xlu1 %v2109_v59  ;;  %v1714_v46 = vsel %vm79_vm0, %v3741_v61, 0.0  ;;  %v3743_v62 = vpop.eup %3742 }
 0xf77   :  { %v2106_v63 = vsel %vm79_vm0, %v3743_v62, 0.0  ;;  %v3745_v0 = vpop.eup %3744 }
 0xf78   :  { %v1824_v1 = vsel %vm79_vm0, %v3745_v0, 0.0  ;;  %v4362_v2 = vpop.eup %3746 }
 0xf79   :  { %v2307_v3 = vsel %vm79_vm0, %v4362_v2, 0.0  ;;  %v3749_v31 = vpop.eup %3748 }
 0xf7a   :  { %1715 = vadd.xlane.f32.xlu1 %v1714_v46  ;;  %v1821_v43 = vsel %vm79_vm0, %v3749_v31, 0.0  ;;  %v4372_v32 = vpop.eup %3750 }
 0xf7b   :  { %v2304_v5 = vsel %vm79_vm0, %v4372_v32, 0.0 }
 0xf7e   :  { %2107 = vadd.xlane.f32.xlu1 %v2106_v63 }
 0xf82   :  { %1825 = vadd.xlane.f32.xlu1 %v1824_v1 }
 0xf86   :  { %2308 = vadd.xlane.f32.xlu1 %v2307_v3 }
 0xf8a   :  { %1822 = vadd.xlane.f32.xlu1 %v1821_v43 }
 0xf9b   :  { %3682 = vrot.lane.b32.xlu1 %v3681_v45, %s3777_s3 }
 0xfbf   :  { %2305 = vadd.xlane.f32.xlu1 %v2304_v5  ;;  %v2983_v5 = vld [vmem:[%s4538_s13 + $0x20] sm:$0xff] }
 0xfd0   :  { %3692 = vrot.lane.b32.xlu1 %v3691_v49, %s3777_s3  ;;  %v3690_v49 = vunpack.i.h.bf16 %v3688_v14  ;;  %v2995_v14 = vld [vmem:[%s4539_s15 + $0xa0] sm:$0xff] }
 0xfd2   :  { %v3562_v20 = vpack.c.bf16 %v3690_v49, %v3689_v17  ;;  %v2998_v49 = vld [vmem:[%s4539_s15 + $0xb8] sm:$0xff] }
 0xffb   :  { %v1719_v6 = vpop.xlane.xlu1 %1718 }
0x1003   :  { %v2111_v7 = vpop.xlane.xlu1 %2110 }
0x1007   :  { %v1716_v8 = vpop.xlane.xlu1 %1715 }
0x1008   :  { %3752 = vrcp.f32 %v1716_v8 }
0x100b   :  { %v2108_v41 = vpop.xlane.xlu1 %2107 }
0x100f   :  { %v1826_v11 = vpop.xlane.xlu1 %1825 }
0x1010   :  { %3754 = vrcp.f32 %v1826_v11 }
0x1012   :  { %v3753_v16 = vpop.eup %3752 }
0x1013   :  { %v2309_v45 = vpop.xlane.xlu1 %2308  ;;  %v1722_v19 = vmul.f32 %v3753_v16, %v3741_v61  ;;  %v2996_v16 = vld [vmem:[%s4539_s15 + $0xa8] sm:$0xff] }
0x1017   :  { %v1823_v35 = vpop.xlane.xlu1 %1822 }
0x1018   :  { %3756 = vrcp.f32 %v1823_v35  ;;  %v2992_v35 = vld [vmem:[%s4539_s15 + $0x88] sm:$0xff] }
0x1019   :  { %3758 = vrcp.f32 %v1719_v6  ;;  %v2984_v6 = vld [vmem:[%s4538_s13 + $0x28] sm:$0xff] }
0x101a   :  { %3760 = vrcp.f32 %v2108_v41  ;;  %v3755_v54 = vpop.eup %3754  ;;  %v3584_v8 = vpack.c.bf16 %v2984_v6, %v2983_v5  ;;  %v2986_v41 = vld [vmem:[%s4538_s13 + $0x38] sm:$0xff] }
0x101b   :  { %v3683_v9 = vpop.permute.xlu1 %3682  ;;  %v1830_v52 = vmul.f32 %v3755_v54, %v3745_v0  ;;  %3762 = vrcp.f32 %v2111_v7  ;;  %v2985_v7 = vld [vmem:[%s4538_s13 + $0x30] sm:$0xff]  ;;  %v3600_v54 = vpack.c.bf16 %v2996_v16, %v2995_v14  ;;  %v2796_v14 = vld [vmem:[%s4546_s19 + $0x18] sm:$0xff] }
0x101c   :  { %v3685_v10 = vunpack.i.h.bf16 %v3683_v9  ;;  %v3684_v12 = vunpack.i.l.bf16 %v3683_v9  ;;  %3764 = vrcp.f32 %v2309_v45  ;;  %v3588_v11 = vpack.c.bf16 %v2986_v41, %v2985_v7  ;;  %3585 = vmatprep.subr.bf16.mxu0 %v3584_v8  ;;  %v2991_v45 = vld [vmem:[%s4539_s15 + $0x80] sm:$0xff]  ;;  %v2993_v9 = vld [vmem:[%s4539_s15 + $0x90] sm:$0xff] }
0x101d   :  { %3587 = vmatpush3.bf16.msra.mxu0 %v3584_v8 }
0x101e   :  { %v3552_v13 = vpack.c.bf16 %v3685_v10, %v3684_v12  ;;  %3589 = vmatprep.subr.bf16.mxu0 %v3588_v11  ;;  %v3592_v10 = vpack.c.bf16 %v2992_v35, %v2991_v45  ;;  %v2994_v12 = vld [vmem:[%s4539_s15 + $0x98] sm:$0xff] }
0x1020   :  { %3553 = vmatprep.subr.bf16.mxu1 %v3552_v13 }
0x1021   :  { %3591 = vmatpush3.bf16.msra.mxu0 %v3588_v11 }
0x1022   :  { %v3757_v48 = vpop.eup %3756 }
0x1023   :  { %v1829_v18 = vmul.f32 %v3757_v48, %v3749_v31  ;;  %v3759_v51 = vpop.eup %3758  ;;  %v2997_v48 = vld [vmem:[%s4539_s15 + $0xb0] sm:$0xff] }
0x1024   :  { %v3761_v21 = vpop.eup %3760  ;;  %v1723_v15 = vmul.f32 %v3759_v51, %v4350_v37  ;;  %v2973_v37 = vld [vmem:[%s4536_s9 + $0x30] sm:$0xff]  ;;  %v3604_v17 = vpack.c.bf16 %v2998_v49, %v2997_v48  ;;  %v3002_v51 = vld [vmem:[%s4539_s15 + $0xd8] sm:$0xff] }
0x1025   :  { %3322 = vmatprep.mubr.msk.f32.mxu1 %vm79_vm0, %v1829_v18  ;;  %v2114_v25 = vmul.f32 %v3761_v21, %v3743_v62  ;;  %v3763_v26 = vpop.eup %3762  ;;  %v3580_v55 = vpack.c.bf16 %v2974_v47, %v2973_v37  ;;  %v2999_v18 = vld [vmem:[%s4539_s15 + $0xc0] sm:$0xff] }
0x1026   :  { %3323 = vmatmul.mubr.msk.f32.vlgmr.msra.gmra.mrb[14].mxu1 %vm79_vm0, %v1830_v52  ;;  %v2115_v29 = vmul.f32 %v3763_v26, %v4354_v60  ;;  %v3765_v42 = vpop.eup %3764  ;;  %v3000_v52 = vld [vmem:[%s4539_s15 + $0xc8] sm:$0xff] }
0x1027   :  { %3555 = vmatpush3.bf16.msra.mxu1 %v3552_v13  ;;  %3329 = vmatprep.mubr.msk.f32.mxu1 %vm79_vm0, %v1722_v19  ;;  %v2313_v53 = vmul.f32 %v3765_v42, %v4362_v2  ;;  %v3596_v13 = vpack.c.bf16 %v2994_v12, %v2993_v9  ;;  %v3608_v19 = vpack.c.bf16 %v3000_v52, %v2999_v18  ;;  %v2982_v42 = vld [vmem:[%s4541_s12 + $0x1] ss:$0 sm:$0xff]  ;;  %v2795_v12 = vld [vmem:[%s4546_s19 + $0x10] sm:$0xff] }
0x1028   :  { %3563 = vmatprep.subr.bf16.mxu1 %v3562_v20  ;;  %v2793_v9 = vld [vmem:[%s4546_s19] sm:$0xff]  ;;  %v3628_v16 = vpack.c.bf16 %v2796_v14, %v2795_v12 }
0x102e   :  { %3330 = vmatmul.mubr.msk.f32.vlgmr.msra.gmra.mrb[14].mxu1 %vm79_vm0, %v1723_v15  ;;  %v3003_v15 = vld [vmem:[%s4539_s15 + $0xe0] sm:$0xff] }
0x102f   :  { %3565 = vmatpush3.bf16.msra.mxu1 %v3562_v20  ;;  %3343 = vmatprep.mubr.msk.f32.mxu1 %vm79_vm0, %v2114_v25  ;;  %v3001_v20 = vld [vmem:[%s4539_s15 + $0xd0] sm:$0xff]  ;;  %v3004_v25 = vld [vmem:[%s4539_s15 + $0xe8] sm:$0xff] }
0x1030   :  { %v3612_v21 = vpack.c.bf16 %v3002_v51, %v3001_v20  ;;  %v3616_v26 = vpack.c.bf16 %v3004_v25, %v3003_v15  ;;  %v3011_v20 = vld [vmem:[%s4544_s17 + $0x1] ss:$0 sm:$0xff] }
0x1031   :  { %v3012_v25 = vld [vmem:[%s4545_s18 + $0x1] ss:$0 sm:$0xff] }
0x1036   :  { %3344 = vmatmul.mubr.msk.f32.vlgmr.msra.gmra.mrb[14].mxu1 %vm79_vm0, %v2115_v29 }
0x104c   :  { %v2306_v30 = vpop.xlane.xlu1 %2305 }
0x104d   :  { %3766 = vrcp.f32 %v2306_v30 }
0x1050   :  { %v3693_v22 = vpop.permute.xlu1 %3692 }
0x1051   :  { %v3695_v40 = vunpack.i.h.bf16 %v3693_v22  ;;  %v3694_v28 = vunpack.i.l.bf16 %v3693_v22 }
0x1053   :  { %v3572_v38 = vpack.c.bf16 %v3695_v40, %v3694_v28 }
0x1055   :  { %3573 = vmatprep.subr.bf16.mxu1 %v3572_v38 }
0x1056   :  { %3575 = vmatpush3.bf16.msra.mxu1 %v3572_v38  ;;  %v2981_v38 = vld [vmem:[%s4540_s11 + $0x1] ss:$0 sm:$0xff] }
0x1057   :  { %v3767_v44 = vpop.eup %3766  ;;  %3577 = vmatprep.subr.bf16.mxu1 %v3576_v27 }
0x1058   :  { %v2312_v50 = vmul.f32 %v3767_v44, %v4372_v32 }
0x105a   :  { %3357 = vmatprep.mubr.msk.f32.mxu1 %vm79_vm0, %v2312_v50 }
0x105b   :  { %3358 = vmatmul.mubr.msk.f32.vlgmr.msra.gmra.mrb[14].mxu1 %vm79_vm0, %v2313_v53 }
0x105c   :  { %3579 = vmatpush3.bf16.msra.mxu1 %v3576_v27 }
0x105d   :  { %3581 = vmatprep.subr.bf16.mxu1 %v3580_v55 }
0x1060   :  { %3583 = vmatpush3.bf16.msra.mxu1 %v3580_v55 }
0x1061   :  { %3593 = vmatprep.subr.bf16.mxu1 %v3592_v10 }
0x112e   :  { %v3359_v56 = vpop.f32.mrb[14].mxu1 }
0x112f   :  { %v2396_v60 = vpop.f32.mrb[15].mxu1 }
0x1130   :  { %3368 = vmatprep.mubr.msk.f32.mxu1 %vm211_vm3, %v2396_v60  ;;  %v3006_v60 = vld [vmem:[%s4539_s15 + $0xf8] sm:$0xff] }
0x1131   :  { %3369 = vmatmul.mubr.msk.f32.vlgmr.msra.gmra.mrb[16].mxu1 %vm211_vm3, %v3359_v56  ;;  %v3005_v56 = vld [vmem:[%s4539_s15 + $0xf0] sm:$0xff] }
0x1132   :  { %3595 = vmatpush3.bf16.msra.mxu1 %v3592_v10  ;;  %v2794_v10 = vld [vmem:[%s4546_s19 + $0x8] sm:$0xff] }
0x1133   :  { %3597 = vmatprep.subr.bf16.mxu1 %v3596_v13 }
0x1136   :  { %3599 = vmatpush3.bf16.msra.mxu1 %v3596_v13  ;;  %v3624_v13 = vpack.c.bf16 %v2794_v10, %v2793_v9 }
0x1137   :  { %3601 = vmatprep.subr.bf16.mxu1 %v3600_v54 }
0x1138   :  { %3625 = vmatprep.subr.bf16.mxu0 %v3624_v13 }
0x113a   :  { %3603 = vmatpush3.bf16.msra.mxu1 %v3600_v54 }
0x113b   :  { %3605 = vmatprep.subr.bf16.mxu1 %v3604_v17 }
0x113e   :  { %3607 = vmatpush3.bf16.msra.mxu1 %v3604_v17 }
0x113f   :  { %3609 = vmatprep.subr.bf16.mxu1 %v3608_v19 }
0x1142   :  { %3611 = vmatpush3.bf16.msra.mxu1 %v3608_v19 }
0x1143   :  { %3613 = vmatprep.subr.bf16.mxu1 %v3612_v21 }
0x1146   :  { %3615 = vmatpush3.bf16.msra.mxu1 %v3612_v21 }
0x1147   :  { %3617 = vmatprep.subr.bf16.mxu1 %v3616_v26 }
0x114a   :  { %3619 = vmatpush3.bf16.msra.mxu1 %v3616_v26 }
0x1204   :  { %v3370_v58 = vpop.f32.mrb[16].mxu1 }
0x1205   :  { %v2498_v59 = vadd.f32 %v3370_v58, %v2976_v57  ;;  %v2492_v61 = vpop.f32.mrb[17].mxu1  ;;  %v2988_v58 = vld [vmem:[%s4542_s14 + $0x1] ss:$0 sm:$0xff] }
0x1206   :  { %v2493_v34 = vadd.f32 %v2976_v57, %v2492_v61  ;;  %v3620_v57 = vpack.c.bf16 %v3006_v60, %v3005_v56 }
0x1207   :  { %v2502_v46 = vadd.f32 %v2498_v59, %v4246_v24 }
0x1208   :  { %v2501_v62 = vadd.f32 %v2493_v34, %v4244_v23  ;;  %3621 = vmatprep.subr.bf16.mxu1 %v3620_v57 }
0x1209   :  { %v2510_v63 = vsel %vm211_vm3, %v2502_v46, 0.0  ;;  %3623 = vmatpush3.bf16.msra.mxu1 %v3620_v57 }
0x120a   :  { %2511 = vadd.xlane.f32.xlu1 %v2510_v63  ;;  %v2507_v0 = vsel %vm211_vm3, %v2501_v62, 0.0 }
0x120b   :  { %2508 = vadd.xlane.f32.xlu0 %v2507_v0  ;;  %v3008_v0 = vld [vmem:[%s4543_s16 + $0x1] ss:$0 sm:$0xff] }
0x1297   :  { %v2512_v1 = vpop.xlane.xlu1 %2511 }
0x1298   :  { %v2514_v2 = vmul.f32 0.03125, %v2512_v1  ;;  %v2509_v3 = vpop.xlane.xlu0 %2508 }
0x1299   :  { %v2513_v31 = vmul.f32 0.03125, %v2509_v3 }
0x129a   :  { %v4413_v43 = vsub.f32 %v2502_v46, %v2514_v2 }
0x129b   :  { %v2515_v33 = vsub.f32 %v2501_v62, %v2513_v31 }
0x129c   :  { %v2518_v24 = vmul.f32 %v4413_v43, %v4413_v43 }
0x129d   :  { %v2517_v4 = vmul.f32 %v2515_v33, %v2515_v33 }
0x129e   :  { %v2522_v23 = vsel %vm211_vm3, %v2518_v24, 0.0 }
0x129f   :  { %v2519_v32 = vsel %vm211_vm3, %v2517_v4, 0.0 }
0x12a0   :  { %2520 = vadd.xlane.f32.xlu0 %v2519_v32 }
0x12a4   :  { %2523 = vadd.xlane.f32.xlu0 %v2522_v23 }
0x132d   :  { %v2521_v29 = vpop.xlane.xlu0 %2520 }
0x132e   :  { %v2525_v30 = vmul.f32 0.03125, %v2521_v29 }
0x1330   :  { %v2527_v22 = vadd.f32 1e-05, %v2525_v30 }
0x1331   :  { %v2524_v36 = vpop.xlane.xlu0 %2523 }
0x1332   :  { %3768 = vrsqrt.f32 %v2527_v22  ;;  %v2526_v39 = vmul.f32 0.03125, %v2524_v36  ;;  %v3013_v36 = vld [vmem:[%s4547_s20] ss:$0 sm:$0xff] }
0x1334   :  { %v2528_v40 = vadd.f32 1e-05, %v2526_v39 }
0x1336   :  { %3770 = vrsqrt.f32 %v2528_v40 }
0x133c   :  { %v3769_v28 = vpop.eup %3768 }
0x133d   :  { %v2531_v27 = vmul.f32 %v3769_v28, %v2515_v33 }
0x133f   :  { %v2539_v37 = vmul.f32 %v2981_v38, %v2531_v27 }
0x1340   :  { %v3771_v47 = vpop.eup %3770 }
0x1341   :  { %v2532_v44 = vmul.f32 %v3771_v47, %v4413_v43  ;;  %v2547_v50 = vadd.f32 %v2982_v42, %v2539_v37 }
0x1343   :  { %v2540_v53 = vmul.f32 %v2981_v38, %v2532_v44  ;;  %3379 = vmatprep.mubr.msk.f32.mxu0 %vm211_vm3, %v2547_v50 }
0x1345   :  { %v2548_v55 = vadd.f32 %v2982_v42, %v2540_v53 }
0x1347   :  { %3380 = vmatmul.mubr.msk.f32.vlgmr.msra.gmra.mrb[16].mxu0 %vm211_vm3, %v2548_v55 }
0x1348   :  { %3627 = vmatpush3.bf16.msra.mxu0 %v3624_v13 }
0x1349   :  { %3629 = vmatprep.subr.bf16.mxu0 %v3628_v16 }
0x134c   :  { %3631 = vmatpush3.bf16.msra.mxu0 %v3628_v16 }
0x141a   :  { %v3381_v59 = vpop.f32.mrb[16].mxu0 }
0x141b   :  { %v2640_v61 = vadd.f32 %v3381_v59, %v2988_v58  ;;  %v2634_v34 = vpop.f32.mrb[17].mxu0 }
0x141c   :  { %v2635_v46 = vadd.f32 %v2988_v58, %v2634_v34 }
0x141d   :  { %v2644_v63 = vmax.f32 %v2640_v61, 0.0 }
0x141e   :  { %v2643_v62 = vmax.f32 %v2635_v46, 0.0 }
0x1420   :  { %3414 = vmatprep.mubr.f32.mxu1 %v2643_v62 }
0x1421   :  { %3415 = vmatmul.mubr.f32.vlgmr.msra.gmra.mrb[18].mxu1 %v2644_v63 }
0x14f4   :  { %v3416_v1 = vpop.f32.mrb[18].mxu1 }
0x14f5   :  { %v2742_v2 = vadd.f32 %v3416_v1, %v3008_v0  ;;  %v2736_v3 = vpop.f32.mrb[19].mxu1 }
0x14f6   :  { %v2737_v31 = vadd.f32 %v3008_v0, %v2736_v3 }
0x14f7   :  { %v2746_v43 = vadd.f32 %v2742_v2, %v2548_v55 }
0x14f8   :  { %v2745_v33 = vadd.f32 %v2737_v31, %v2547_v50 }
0x14f9   :  { %v2754_v4 = vsel %vm211_vm3, %v2746_v43, 0.0 }
0x14fa   :  { %2755 = vadd.xlane.f32.xlu1 %v2754_v4  ;;  %v2751_v32 = vsel %vm211_vm3, %v2745_v33, 0.0 }
0x14fb   :  { %2752 = vadd.xlane.f32.xlu0 %v2751_v32 }
0x1587   :  { %v2756_v24 = vpop.xlane.xlu1 %2755 }
0x1588   :  { %v2758_v23 = vmul.f32 0.03125, %v2756_v24  ;;  %v2753_v5 = vpop.xlane.xlu0 %2752 }
0x1589   :  { %v2757_v6 = vmul.f32 0.03125, %v2753_v5 }
0x158a   :  { %v2760_v7 = vsub.f32 %v2746_v43, %v2758_v23 }
0x158b   :  { %v2759_v8 = vsub.f32 %v2745_v33, %v2757_v6 }
0x158c   :  { %v2762_v41 = vmul.f32 %v2760_v7, %v2760_v7 }
0x158d   :  { %v2761_v11 = vmul.f32 %v2759_v8, %v2759_v8 }
0x158e   :  { %v2766_v45 = vsel %vm211_vm3, %v2762_v41, 0.0 }
0x158f   :  { %2767 = vadd.xlane.f32.xlu1 %v2766_v45  ;;  %v2763_v35 = vsel %vm211_vm3, %v2761_v11, 0.0 }
0x1590   :  { %2764 = vadd.xlane.f32.xlu0 %v2763_v35 }
0x161c   :  { %v2768_v54 = vpop.xlane.xlu1 %2767 }
0x161d   :  { %v2770_v48 = vmul.f32 0.03125, %v2768_v54  ;;  %v2765_v49 = vpop.xlane.xlu0 %2764 }
0x161e   :  { %v2769_v17 = vmul.f32 0.03125, %v2765_v49 }
0x161f   :  { %v2772_v18 = vadd.f32 1e-05, %v2770_v48 }
0x1620   :  { %v2771_v52 = vadd.f32 1e-05, %v2769_v17 }
0x1621   :  { %3772 = vrsqrt.f32 %v2772_v18 }
0x1622   :  { %3774 = vrsqrt.f32 %v2771_v52 }
0x162b   :  { %v3773_v19 = vpop.eup %3772 }
0x162c   :  { %v3775_v51 = vpop.eup %3774  ;;  %v2776_v21 = vmul.f32 %v3773_v19, %v2760_v7 }
0x162d   :  { %v2775_v15 = vmul.f32 %v3775_v51, %v2759_v8 }
0x162e   :  { %v2784_v26 = vmul.f32 %v3011_v20, %v2776_v21 }
0x162f   :  { %v2783_v29 = vmul.f32 %v3011_v20, %v2775_v15 }
0x1630   :  { %v2792_v22 = vadd.f32 %v3012_v25, %v2784_v26 }
0x1631   :  { %v2791_v30 = vadd.f32 %v3012_v25, %v2783_v29 }
0x1633   :  { %3425 = vmatprep.mubr.msk.f32.mxu0 %vm211_vm3, %v2791_v30 }
0x1634   :  { %3426 = vmatmul.mubr.msk.f32.vlgmr.msra.gmra.mrb[18].mxu0 %vm211_vm3, %v2792_v22 }
0x1707   :  { %v3427_v39 = vpop.f32.mrb[18].mxu0 }
0x1708   :  { %v2882_v40 = vadd.f32 %v3427_v39, %v3013_v36  ;;  %v2876_v28 = vpop.f32.mrb[19].mxu0 }
0x1709   :  { %v2877_v38 = vadd.f32 %v3013_v36, %v2876_v28 }
0x170a   :  { %2886 = vst [vmem:[%s4548_s21 + $0x8] sm:$0xff] %v2882_v40 }
0x170b   :  { %2885 = vst [vmem:[%s4548_s21] sm:$0xff] %v2877_v38 }

</bundles_post_ra>
